<compile_context>
chip_gen: v7x
topology: tpu7x:2x2x1
jax: 0.10.0
libtpu: 0.0.40
codegen_flags: <defaults>
</compile_context>

<pallas_src>
import functools

import numpy as np
import jax
import jax.numpy as jnp
from jax import lax
from jax.experimental import pallas as pl
from jax.experimental.pallas import tpu as pltpu


# ---------------------------------------------------------------------------
# Module-derived constants
# ---------------------------------------------------------------------------
OUTPUT_SR = 16000
RESAMPLE_SR = 16000
WINDOW_MS = 30
N_FFT = 2 * WINDOW_MS * RESAMPLE_SR // 2000   # 480
HOP = N_FFT // 2                              # 240
NUM_FREQ = N_FFT // 2 + 1                     # 241 (onesided)

TILE_T = 1024   # frame-chunk size for long clips (multiple of 256; ~8-11 MiB working set)
SEAM = 128      # small block used to re-read the seam frame of the next chunk
MAX_BBLK = 8    # max clips per grid step on the short-clip path


def _raw_istft_constants():
    """Windowed inverse-rDFT matrices + inverse window-square envelope (numpy, float64)."""
    N = N_FFT
    n = np.arange(N, dtype=np.float64)
    k = np.arange(NUM_FREQ, dtype=np.float64)[:, None]
    ang = 2.0 * np.pi * k * n[None, :] / N                      # (F, N)
    wk = np.where((k == 0) | (k == N // 2), 1.0, 2.0)           # Hermitian weights
    C = wk * np.cos(ang) / N                                    # real-part basis
    S = -wk * np.sin(ang) / N                                   # imag-part basis
    # hann window, periodic=True (torch.hann_window default), win_length = n_fft
    win = 0.5 - 0.5 * np.cos(2.0 * np.pi * n / N)               # (N,)
    Cw = C * win[None, :]
    Sw = S * win[None, :]
    # window^2 overlap-add envelope for interior blocks (hop = N/2); >= 0.5 everywhere
    env_inv = 1.0 / (win[:HOP] ** 2 + win[HOP:] ** 2)           # (HOP,)
    return Cw, Sw, env_inv


@functools.lru_cache(maxsize=1)
def _istft_basis():
    """Half-frame synthesis bases (bf16) with the OLA envelope folded in (built once)."""
    Cw, Sw, env_inv = _raw_istft_constants()
    blo_re = jnp.asarray(Cw[:, :HOP] * env_inv, jnp.bfloat16)    # (F, HOP)
    blo_im = jnp.asarray(Sw[:, :HOP] * env_inv, jnp.bfloat16)
    bhi_re = jnp.asarray(Cw[:, HOP:] * env_inv, jnp.bfloat16)
    bhi_im = jnp.asarray(Sw[:, HOP:] * env_inv, jnp.bfloat16)
    return blo_re, blo_im, bhi_re, bhi_im


# ---------------------------------------------------------------------------
# Kernels
# ---------------------------------------------------------------------------
def _synth_lo_hi(re_t, im_t, blo_re, blo_im, bhi_re, bhi_im):
    """re_t/im_t: (T_blk, F) bf16.  Returns lo/hi: (T_blk, HOP) f32, envelope pre-applied."""
    lo = (jnp.dot(re_t, blo_re, preferred_element_type=jnp.float32)
          + jnp.dot(im_t, blo_im, preferred_element_type=jnp.float32))
    hi = (jnp.dot(re_t, bhi_re, preferred_element_type=jnp.float32)
          + jnp.dot(im_t, bhi_im, preferred_element_type=jnp.float32))
    return lo, hi


def _istft_batched_kernel(re_ref, im_ref, blo_re_ref, blo_im_ref,
                          bhi_re_ref, bhi_im_ref, out_ref, *, bblk):
    """Path A: whole clip per batch element, `bblk` clips per grid step (T <= TILE_T)."""
    blo_re = blo_re_ref[...]
    blo_im = blo_im_ref[...]
    bhi_re = bhi_re_ref[...]
    bhi_im = bhi_im_ref[...]
    # Static unrolled loop over the clips of this batch block (bblk <= 8, small live set).
    for b in range(bblk):
        # One shared (F,T)->(T,F) relayout per operand, reused by the lo and hi dots.
        re_t = jnp.transpose(re_ref[b]).astype(jnp.bfloat16)     # (T, F)
        im_t = jnp.transpose(im_ref[b]).astype(jnp.bfloat16)
        lo, hi = _synth_lo_hi(re_t, im_t, blo_re, blo_im, bhi_re, bhi_im)
        # out[j] = hi[j] + lo[j+1], j = 0..T-2
        out_ref[b] = hi[:-1, :] + lo[1:, :]


def _istft_tiled_kernel(re_ref, im_ref, re_seam_ref, im_seam_ref,
                        blo_re_ref, blo_im_ref, bhi_re_ref, bhi_im_ref, out_ref):
    """Path B: one TILE_T-row output chunk; carry-free (seam frame recomputed locally).

    Chunk c produces output rows [c*TILE_T, (c+1)*TILE_T) using frames [c*TILE_T, (c+1)*TILE_T)
    plus the first frame of the next chunk (the "seam"), read from a small SEAM-wide block.
    Rows past T-2 and OOB-padded seam data only feed masked (never-written-back) output rows.
    """
    blo_re = blo_re_ref[...]
    blo_im = blo_im_ref[...]
    bhi_re = bhi_re_ref[...]
    bhi_im = bhi_im_ref[...]

    # Main chunk.
    re_t = jnp.transpose(re_ref[0]).astype(jnp.bfloat16)        # (TILE_T, F)
    im_t = jnp.transpose(im_ref[0]).astype(jnp.bfloat16)
    lo, hi = _synth_lo_hi(re_t, im_t, blo_re, blo_im, bhi_re, bhi_im)

    # Seam: lo of frame (c+1)*TILE_T (frame 0 of the seam block).
    sre_t = jnp.transpose(re_seam_ref[0]).astype(jnp.bfloat16)  # (SEAM, F)
    sim_t = jnp.transpose(im_seam_ref[0]).astype(jnp.bfloat16)
    lo_seam = (jnp.dot(sre_t, blo_re, preferred_element_type=jnp.float32)
               + jnp.dot(sim_t, blo_im, preferred_element_type=jnp.float32))  # (SEAM, HOP)

    # Two-store overlap-add epilogue (no full-tile concat intermediate).
    tt = out_ref.shape[1]                                        # == TILE_T (static)
    out_ref[0, 0:tt - 1, :] = hi[0:tt - 1, :] + lo[1:tt, :]
    out_ref[0, tt - 1:tt, :] = hi[tt - 1:tt, :] + lo_seam[0:1, :]


# ---------------------------------------------------------------------------
# Wrapper
# ---------------------------------------------------------------------------
def post_processing_forward(spec_re, spec_im):
    """spec_re/spec_im: (B, F, T) float32 (real/imag of the complex spectrogram).

    Returns waveform (B, HOP * (T - 1)) float32  (Resample 16k -> 16k is the identity).
    """
    B, F, T = spec_re.shape
    assert F == NUM_FREQ, f"expected {NUM_FREQ} frequency bins, got {F}"
    assert T >= 2, "torch.istft with center=True needs at least 2 frames"
    basis = _istft_basis()

    cost = pl.CostEstimate(
        flops=4 * B * T * NUM_FREQ * N_FFT,
        transcendentals=0,
        bytes_accessed=4 * (2 * B * NUM_FREQ * T + B * (T - 1) * HOP) + 2 * 4 * NUM_FREQ * HOP,
    )

    if T <= TILE_T:
        # Path A: whole utterance per clip, several clips per grid step (amortizes the
        # ~0.35 us per-step overhead for short clips).
        bblk = int(min(B, MAX_BBLK, max(1, TILE_T // T)))
        nb = (B + bblk - 1) // bblk
        const_specs = [pl.BlockSpec((NUM_FREQ, HOP), lambda g: (0, 0)) for _ in range(4)]
        kernel = functools.partial(_istft_batched_kernel, bblk=bblk)
        out = pl.pallas_call(
            kernel,
            out_shape=jax.ShapeDtypeStruct((B, T - 1, HOP), jnp.float32),
            grid=(nb,),
            in_specs=[pl.BlockSpec((bblk, NUM_FREQ, T), lambda g: (g, 0, 0)),
                      pl.BlockSpec((bblk, NUM_FREQ, T), lambda g: (g, 0, 0))] + const_specs,
            out_specs=pl.BlockSpec((bblk, T - 1, HOP), lambda g: (g, 0, 0)),
            compiler_params=pltpu.CompilerParams(dimension_semantics=("parallel",)),
            cost_estimate=cost,
        )(spec_re, spec_im, *basis)
    else:
        # Path B: carry-free frame tiling.  Grid over (batch, output-row chunks); each chunk
        # re-reads a small SEAM block to recompute lo of the next chunk's first frame, so both
        # axes are independent ("parallel" => megacore-shardable on v7x even at B=1).
        c_out = (T - 1 + TILE_T - 1) // TILE_T       # output row chunks
        n_seam = (T + SEAM - 1) // SEAM              # SEAM-blocks along the frame axis
        tpb = TILE_T // SEAM

        def main_idx(b, c):
            return (b, 0, c)

        def seam_idx(b, c, tpb=tpb, n_seam=n_seam):
            # Block whose first frame is (c+1)*TILE_T; clamp when past the end (the row it
            # feeds, global (c+1)*TILE_T - 1 >= T-1, is a masked output row in that case).
            return (b, 0, jnp.minimum((c + 1) * tpb, n_seam - 1))

        const_specs = [pl.BlockSpec((NUM_FREQ, HOP), lambda b, c: (0, 0)) for _ in range(4)]
        out = pl.pallas_call(
            _istft_tiled_kernel,
            out_shape=jax.ShapeDtypeStruct((B, T - 1, HOP), jnp.float32),
            grid=(B, c_out),
            in_specs=[pl.BlockSpec((1, NUM_FREQ, TILE_T), main_idx),
                      pl.BlockSpec((1, NUM_FREQ, TILE_T), main_idx),
                      pl.BlockSpec((1, NUM_FREQ, SEAM), seam_idx),
                      pl.BlockSpec((1, NUM_FREQ, SEAM), seam_idx)] + const_specs,
            out_specs=pl.BlockSpec((1, TILE_T, HOP), lambda b, c: (b, c, 0)),
            compiler_params=pltpu.CompilerParams(
                dimension_semantics=("parallel", "parallel")),
            cost_estimate=cost,
        )(spec_re, spec_im, spec_re, spec_im, *basis)

    # TODO(synk): torchaudio.Resample with orig_freq != new_freq (polyphase sinc conv)
    # is not needed here since 16000 -> 16000 is the identity in torchaudio.
    return out.reshape(B, (T - 1) * HOP)


# ---------------------------------------------------------------------------
# Pure-JAX f32 reference (same math, unsplit basis) for a sanity check
# ---------------------------------------------------------------------------
def _reference(spec_re, spec_im):
    Cw_np, Sw_np, env_inv_np = _raw_istft_constants()
    Cw = jnp.asarray(Cw_np, jnp.float32)
    Sw = jnp.asarray(Sw_np, jnp.float32)
    env_inv = jnp.asarray(env_inv_np, jnp.float32)
    hp = jax.lax.Precision.HIGHEST
    frames = (jnp.einsum('bft,fn->btn', spec_re, Cw, precision=hp)
              + jnp.einsum('bft,fn->btn', spec_im, Sw, precision=hp))          # (B, T, N)
    blocks = (frames[:, 1:, :HOP] + frames[:, :-1, HOP:]) * env_inv[None, None, :]
    B, Tm1, _ = blocks.shape
    return blocks.reshape(B, Tm1 * HOP)


def _check(wave, spec_re, spec_im):
    # bf16 MXU operands with f32 accumulation => ~1e-3-level relative error vs the f32 ref.
    np.testing.assert_allclose(np.asarray(wave), np.asarray(_reference(spec_re, spec_im)),
                               rtol=2e-2, atol=3e-3)


if __name__ == "__main__":
    key = jax.random.PRNGKey(0)
    k1, k2, k3, k4, k5, k6 = jax.random.split(key, 6)

    # 1) Tiny clip: Path A, single batch block.
    B, T = 2, 8
    spec_re = jax.random.normal(k1, (B, NUM_FREQ, T), dtype=jnp.float32)
    spec_im = jax.random.normal(k2, (B, NUM_FREQ, T), dtype=jnp.float32)
    wave = post_processing_forward(spec_re, spec_im)
    jax.block_until_ready(wave)
    assert wave.shape == (B, HOP * (T - 1)), wave.shape
    _check(wave, spec_re, spec_im)

    # 2) Path A with batch blocking and a partial (masked) last batch block
    #    (B=3, bblk=2 -> grid of 2 steps, second step half-padded).
    B2, T2 = 3, 400
    spec_re2 = jax.random.normal(k3, (B2, NUM_FREQ, T2), dtype=jnp.float32)
    spec_im2 = jax.random.normal(k4, (B2, NUM_FREQ, T2), dtype=jnp.float32)
    wave2 = post_processing_forward(spec_re2, spec_im2)
    jax.block_until_ready(wave2)
    _check(wave2, spec_re2, spec_im2)

    # 3) Long clip: carry-free Path B (2 frame chunks, partial last output block,
    #    clamped seam block on the final chunk).
    B3, T3 = 1, TILE_T + 200
    spec_re3 = jax.random.normal(k5, (B3, NUM_FREQ, T3), dtype=jnp.float32)
    spec_im3 = jax.random.normal(k6, (B3, NUM_FREQ, T3), dtype=jnp.float32)
    wave3 = post_processing_forward(spec_re3, spec_im3)
    jax.block_until_ready(wave3)
    _check(wave3, spec_re3, spec_im3)

    print("KERNEL_OK")
</pallas_src>

<mosaic_0001>
module attributes {stable_mosaic.version = 11 : i64} {
  func.func @_istft_batched_kernel(%arg0: i32, %arg1: memref<2x241x8xf32, #tpu.memory_space<vmem>>, %arg2: memref<2x241x8xf32, #tpu.memory_space<vmem>>, %arg3: memref<241x240xbf16, #tpu.memory_space<vmem>>, %arg4: memref<241x240xbf16, #tpu.memory_space<vmem>>, %arg5: memref<241x240xbf16, #tpu.memory_space<vmem>>, %arg6: memref<241x240xbf16, #tpu.memory_space<vmem>>, %arg7: memref<2x7x240xf32, #tpu.memory_space<vmem>>) attributes {dimension_semantics = [#tpu.dimension_semantics<parallel>], iteration_bounds = array<i64: 1>, scalar_prefetch = 0 : i64, scratch_operands = 0 : i64, tpu.core_type = #tpu.core_type<tc>, window_params = [{transform_indices = @transform_0, window_bounds = array<i64: 2, 241, 8>}, {transform_indices = @transform_1, window_bounds = array<i64: 2, 241, 8>}, {pipeline_mode = #tpu.pipeline_mode<synchronous>, transform_indices = @transform_2, window_bounds = array<i64: 241, 240>}, {pipeline_mode = #tpu.pipeline_mode<synchronous>, transform_indices = @transform_3, window_bounds = array<i64: 241, 240>}, {pipeline_mode = #tpu.pipeline_mode<synchronous>, transform_indices = @transform_4, window_bounds = array<i64: 241, 240>}, {pipeline_mode = #tpu.pipeline_mode<synchronous>, transform_indices = @transform_5, window_bounds = array<i64: 241, 240>}, {transform_indices = @transform_6, window_bounds = array<i64: 2, 7, 240>}]} {
    %c0 = arith.constant 0 : index
    %c0_0 = arith.constant 0 : index
    %0 = vector.load %arg3[%c0, %c0_0] : memref<241x240xbf16, #tpu.memory_space<vmem>>, vector<241x240xbf16>
    %c0_1 = arith.constant 0 : index
    %c0_2 = arith.constant 0 : index
    %1 = vector.load %arg4[%c0_1, %c0_2] : memref<241x240xbf16, #tpu.memory_space<vmem>>, vector<241x240xbf16>
    %c0_3 = arith.constant 0 : index
    %c0_4 = arith.constant 0 : index
    %2 = vector.load %arg5[%c0_3, %c0_4] : memref<241x240xbf16, #tpu.memory_space<vmem>>, vector<241x240xbf16>
    %c0_5 = arith.constant 0 : index
    %c0_6 = arith.constant 0 : index
    %3 = vector.load %arg6[%c0_5, %c0_6] : memref<241x240xbf16, #tpu.memory_space<vmem>>, vector<241x240xbf16>
    %c0_7 = arith.constant 0 : index
    %c0_8 = arith.constant 0 : index
    %c0_9 = arith.constant 0 : index
    %4 = vector.load %arg1[%c0_7, %c0_8, %c0_9] : memref<2x241x8xf32, #tpu.memory_space<vmem>>, vector<1x241x8xf32>
    %5 = vector.shape_cast %4 : vector<1x241x8xf32> to vector<241x8xf32>
    %6 = tpu.transpose %5, [1, 0] : vector<241x8xf32> -> vector<8x241xf32>
    %7 = arith.truncf %6 : vector<8x241xf32> to vector<8x241xbf16>
    %c0_10 = arith.constant 0 : index
    %c0_11 = arith.constant 0 : index
    %c0_12 = arith.constant 0 : index
    %8 = vector.load %arg2[%c0_10, %c0_11, %c0_12] : memref<2x241x8xf32, #tpu.memory_space<vmem>>, vector<1x241x8xf32>
    %9 = vector.shape_cast %8 : vector<1x241x8xf32> to vector<241x8xf32>
    %10 = tpu.transpose %9, [1, 0] : vector<241x8xf32> -> vector<8x241xf32>
    %11 = arith.truncf %10 : vector<8x241xf32> to vector<8x241xbf16>
    %cst = arith.constant dense<0.000000e+00> : vector<8x240xf32>
    %12 = tpu.matmul %7, %0, %cst {dimension_numbers = #tpu.dot_dimension_numbers<[1], [0], [0], [1], [0, 0, 1, 1], [], []>} : vector<8x241xbf16>, vector<241x240xbf16>, vector<8x240xf32> -> vector<8x240xf32>
    %cst_13 = arith.constant dense<0.000000e+00> : vector<8x240xf32>
    %13 = tpu.matmul %11, %1, %cst_13 {dimension_numbers = #tpu.dot_dimension_numbers<[1], [0], [0], [1], [0, 0, 1, 1], [], []>} : vector<8x241xbf16>, vector<241x240xbf16>, vector<8x240xf32> -> vector<8x240xf32>
    %14 = arith.addf %12, %13 : vector<8x240xf32>
    %cst_14 = arith.constant dense<0.000000e+00> : vector<8x240xf32>
    %15 = tpu.matmul %7, %2, %cst_14 {dimension_numbers = #tpu.dot_dimension_numbers<[1], [0], [0], [1], [0, 0, 1, 1], [], []>} : vector<8x241xbf16>, vector<241x240xbf16>, vector<8x240xf32> -> vector<8x240xf32>
    %cst_15 = arith.constant dense<0.000000e+00> : vector<8x240xf32>
    %16 = tpu.matmul %11, %3, %cst_15 {dimension_numbers = #tpu.dot_dimension_numbers<[1], [0], [0], [1], [0, 0, 1, 1], [], []>} : vector<8x241xbf16>, vector<241x240xbf16>, vector<8x240xf32> -> vector<8x240xf32>
    %17 = arith.addf %15, %16 : vector<8x240xf32>
    %18 = vector.extract_strided_slice %17 {offsets = [0, 0], sizes = [7, 240], strides = [1, 1]} : vector<8x240xf32> to vector<7x240xf32>
    %19 = vector.extract_strided_slice %14 {offsets = [1, 0], sizes = [7, 240], strides = [1, 1]} : vector<8x240xf32> to vector<7x240xf32>
    %20 = arith.addf %18, %19 : vector<7x240xf32>
    %c0_16 = arith.constant 0 : index
    %c0_17 = arith.constant 0 : index
    %c0_18 = arith.constant 0 : index
    %21 = vector.load %arg7[%c0_16, %c0_17, %c0_18] : memref<2x7x240xf32, #tpu.memory_space<vmem>>, vector<1x7x240xf32>
    %22 = vector.shape_cast %21 : vector<1x7x240xf32> to vector<7x240xf32>
    %23 = vector.shape_cast %20 : vector<7x240xf32> to vector<1x7x240xf32>
    tpu.vector_store %arg7[%c0_16, %c0_17, %c0_18], %23 {strides = array<i32>} : memref<2x7x240xf32, #tpu.memory_space<vmem>>, vector<1x7x240xf32>,
    %c1 = arith.constant 1 : index
    %c0_19 = arith.constant 0 : index
    %c0_20 = arith.constant 0 : index
    %24 = vector.load %arg1[%c1, %c0_19, %c0_20] : memref<2x241x8xf32, #tpu.memory_space<vmem>>, vector<1x241x8xf32>
    %25 = vector.shape_cast %24 : vector<1x241x8xf32> to vector<241x8xf32>
    %26 = tpu.transpose %25, [1, 0] : vector<241x8xf32> -> vector<8x241xf32>
    %27 = arith.truncf %26 : vector<8x241xf32> to vector<8x241xbf16>
    %c1_21 = arith.constant 1 : index
    %c0_22 = arith.constant 0 : index
    %c0_23 = arith.constant 0 : index
    %28 = vector.load %arg2[%c1_21, %c0_22, %c0_23] : memref<2x241x8xf32, #tpu.memory_space<vmem>>, vector<1x241x8xf32>
    %29 = vector.shape_cast %28 : vector<1x241x8xf32> to vector<241x8xf32>
    %30 = tpu.transpose %29, [1, 0] : vector<241x8xf32> -> vector<8x241xf32>
    %31 = arith.truncf %30 : vector<8x241xf32> to vector<8x241xbf16>
    %cst_24 = arith.constant dense<0.000000e+00> : vector<8x240xf32>
    %32 = tpu.matmul %27, %0, %cst_24 {dimension_numbers = #tpu.dot_dimension_numbers<[1], [0], [0], [1], [0, 0, 1, 1], [], []>} : vector<8x241xbf16>, vector<241x240xbf16>, vector<8x240xf32> -> vector<8x240xf32>
    %cst_25 = arith.constant dense<0.000000e+00> : vector<8x240xf32>
    %33 = tpu.matmul %31, %1, %cst_25 {dimension_numbers = #tpu.dot_dimension_numbers<[1], [0], [0], [1], [0, 0, 1, 1], [], []>} : vector<8x241xbf16>, vector<241x240xbf16>, vector<8x240xf32> -> vector<8x240xf32>
    %34 = arith.addf %32, %33 : vector<8x240xf32>
    %cst_26 = arith.constant dense<0.000000e+00> : vector<8x240xf32>
    %35 = tpu.matmul %27, %2, %cst_26 {dimension_numbers = #tpu.dot_dimension_numbers<[1], [0], [0], [1], [0, 0, 1, 1], [], []>} : vector<8x241xbf16>, vector<241x240xbf16>, vector<8x240xf32> -> vector<8x240xf32>
    %cst_27 = arith.constant dense<0.000000e+00> : vector<8x240xf32>
    %36 = tpu.matmul %31, %3, %cst_27 {dimension_numbers = #tpu.dot_dimension_numbers<[1], [0], [0], [1], [0, 0, 1, 1], [], []>} : vector<8x241xbf16>, vector<241x240xbf16>, vector<8x240xf32> -> vector<8x240xf32>
    %37 = arith.addf %35, %36 : vector<8x240xf32>
    %38 = vector.extract_strided_slice %37 {offsets = [0, 0], sizes = [7, 240], strides = [1, 1]} : vector<8x240xf32> to vector<7x240xf32>
    %39 = vector.extract_strided_slice %34 {offsets = [1, 0], sizes = [7, 240], strides = [1, 1]} : vector<8x240xf32> to vector<7x240xf32>
    %40 = arith.addf %38, %39 : vector<7x240xf32>
    %c1_28 = arith.constant 1 : index
    %c0_29 = arith.constant 0 : index
    %c0_30 = arith.constant 0 : index
    %41 = vector.load %arg7[%c1_28, %c0_29, %c0_30] : memref<2x7x240xf32, #tpu.memory_space<vmem>>, vector<1x7x240xf32>
    %42 = vector.shape_cast %41 : vector<1x7x240xf32> to vector<7x240xf32>
    %43 = vector.shape_cast %40 : vector<7x240xf32> to vector<1x7x240xf32>
    tpu.vector_store %arg7[%c1_28, %c0_29, %c0_30], %43 {strides = array<i32>} : memref<2x7x240xf32, #tpu.memory_space<vmem>>, vector<1x7x240xf32>,
    return
  }
  func.func @transform_0(%arg0: i32) -> (i32, i32, i32) {
    %c0_i32 = arith.constant 0 : i32
    %c0_i32_0 = arith.constant 0 : i32
    %c0_i32_1 = arith.constant 0 : i32
    return %arg0, %c0_i32, %c0_i32_0 : i32, i32, i32
  }
  func.func @transform_1(%arg0: i32) -> (i32, i32, i32) {
    %c0_i32 = arith.constant 0 : i32
    %c0_i32_0 = arith.constant 0 : i32
    %c0_i32_1 = arith.constant 0 : i32
    return %arg0, %c0_i32, %c0_i32_0 : i32, i32, i32
  }
  func.func @transform_2(%arg0: i32) -> (i32, i32) {
    %c0_i32 = arith.constant 0 : i32
    %c0_i32_0 = arith.constant 0 : i32
    %c0_i32_1 = arith.constant 0 : i32
    return %c0_i32, %c0_i32_0 : i32, i32
  }
  func.func @transform_3(%arg0: i32) -> (i32, i32) {
    %c0_i32 = arith.constant 0 : i32
    %c0_i32_0 = arith.constant 0 : i32
    %c0_i32_1 = arith.constant 0 : i32
    return %c0_i32, %c0_i32_0 : i32, i32
  }
  func.func @transform_4(%arg0: i32) -> (i32, i32) {
    %c0_i32 = arith.constant 0 : i32
    %c0_i32_0 = arith.constant 0 : i32
    %c0_i32_1 = arith.constant 0 : i32
    return %c0_i32, %c0_i32_0 : i32, i32
  }
  func.func @transform_5(%arg0: i32) -> (i32, i32) {
    %c0_i32 = arith.constant 0 : i32
    %c0_i32_0 = arith.constant 0 : i32
    %c0_i32_1 = arith.constant 0 : i32
    return %c0_i32, %c0_i32_0 : i32, i32
  }
  func.func @transform_6(%arg0: i32) -> (i32, i32, i32) {
    %c0_i32 = arith.constant 0 : i32
    %c0_i32_0 = arith.constant 0 : i32
    %c0_i32_1 = arith.constant 0 : i32
    return %arg0, %c0_i32, %c0_i32_0 : i32, i32, i32
  }
}

</mosaic_0001>

<bundles_post_ra>
// kernel: tpu_custom_call.1
= control target key start
LH: loop header
LB: loop body
LE: loop exit
PB: predicated region body
PF: predicated region fallthrough
CT: control target
= control target key end

     0   :  { %vm500_vm0 = vcmask 1040384   ;;  %vm496_vm1 = vcmask 924672   ;;  %vm1168_vm2 = vcmask 915456   ;;  %s3273_s1 = inlined_call_operand.vmem [shape: f32[2,241,8], index: 1, kind: input, shape index: {}]   ;;  %s3274_s3 = inlined_call_operand.vmem [shape: bf16[241,240], index: 3, kind: input, shape index: {}]   ;;  %s3275_s5 = inlined_call_operand.vmem [shape: bf16[241,240], index: 5, kind: input, shape index: {}]   ;;  %s3276_s0 = inlined_call_operand.vmem [shape: f32[2,241,8], index: 0, kind: input, shape index: {}]   ;;  %s3277_s2 = inlined_call_operand.vmem [shape: bf16[241,240], index: 2, kind: input, shape index: {}]   ;;  %s3278_s4 = inlined_call_operand.vmem [shape: bf16[241,240], index: 4, kind: input, shape index: {}]   ;;  %s3279_s6 = inlined_call_operand.vmem [shape: f32[2,7,240], index: 6, kind: output, shape index: {}]  }
   0x1   :  { %v260_v0 = vld [vmem:[%s3273_s1 + $0x80] sm:$0xff]  ;;  %v261_v2 = vld [vmem:[%s3273_s1 + $0x88] sm:$0xff]  ;;  %v262_v4 = vld [vmem:[%s3273_s1 + $0x90] sm:$0xff] }
   0x2   :  { %v244_v1 = vld [vmem:[%s3273_s1] sm:$0xff]  ;;  %307 = vxpose.xlu0.b32.start [1/15] (short) (narrow) %v260_v0, 8  ;;  %v245_v3 = vld [vmem:[%s3273_s1 + $0x8] sm:$0xff]  ;;  %v246_v5 = vld [vmem:[%s3273_s1 + $0x10] sm:$0xff] }
   0x3   :  { %275 = vxpose.xlu1.b32.start [1/16] (narrow) %v244_v1, 8  ;;  %v263_v6 = vld [vmem:[%s3273_s1 + $0x98] sm:$0xff]  ;;  %v1761_v8 = vld [vmem:[%s3274_s3 + $0x4] ss:$8 sps:$4 sm:$0xff]   ;;  %v1765_v12 = vld [vmem:[%s3274_s3] ss:$8 sps:$4 sm:$0xff]  }
   0x4   :  { %v247_v7 = vld [vmem:[%s3273_s1 + $0x18] sm:$0xff]  ;;  %v1763_v9 = vld [vmem:[%s3275_s5 + $0x4] ss:$8 sps:$4 sm:$0xff]   ;;  %509 = vmatprep.subr.bf16.mxu0 %v1761_v8  ;;  %v1766_v13 = vld [vmem:[%s3275_s5] ss:$8 sps:$4 sm:$0xff]  }
   0x5   :  { %v264_v10 = vld [vmem:[%s3273_s1 + $0xa0] sm:$0xff]  ;;  %916 = vmatprep.subr.bf16.mxu1 %v1763_v9  ;;  %510 = vmatpush1.bf16.msra.mxu0 %v1765_v12  ;;  %v1767_v14 = vld [vmem:[%s3274_s3 + $0x14] ss:$8 sps:$4 sm:$0xff]   ;;  %v265_v15 = vld [vmem:[%s3273_s1 + $0xa8] sm:$0xff] }
   0x6   :  { %308 = vxpose.xlu0.b32.cont [2/15] (short) (narrow) %v261_v2, 8  ;;  %v248_v11 = vld [vmem:[%s3273_s1 + $0x20] sm:$0xff]  ;;  %917 = vmatpush1.bf16.msra.mxu1 %v1766_v13  ;;  %v1769_v16 = vld [vmem:[%s3275_s5 + $0x14] ss:$8 sps:$4 sm:$0xff]   ;;  %v1771_v17 = vld [vmem:[%s3274_s3 + $0x10] ss:$8 sps:$4 sm:$0xff]  }
   0x7   :  { %276 = vxpose.xlu1.b32.cont [2/16] (narrow) %v245_v3, 8  ;;  %v249_v18 = vld [vmem:[%s3273_s1 + $0x28] sm:$0xff]  ;;  %v1772_v19 = vld [vmem:[%s3275_s5 + $0x10] ss:$8 sps:$4 sm:$0xff]   ;;  %511 = vmatprep.subr.bf16.mxu0 %v1767_v14  ;;  %v1779_v26 = vld [vmem:[%s3274_s3 + $0x34] ss:$8 sps:$4 sm:$0xff]  }
   0x8   :  { %918 = vmatprep.subr.bf16.mxu1 %v1769_v16  ;;  %v1773_v20 = vld [vmem:[%s3274_s3 + $0x24] ss:$8 sps:$4 sm:$0xff]   ;;  %v266_v22 = vld [vmem:[%s3273_s1 + $0xb0] sm:$0xff]  ;;  %v1777_v24 = vld [vmem:[%s3274_s3 + $0x20] ss:$8 sps:$4 sm:$0xff]  }
   0x9   :  { %512 = vmatpush1.bf16.msra.mxu0 %v1771_v17  ;;  %v1775_v21 = vld [vmem:[%s3275_s5 + $0x24] ss:$8 sps:$4 sm:$0xff]   ;;  %v250_v23 = vld [vmem:[%s3273_s1 + $0x30] sm:$0xff]  ;;  %v1778_v25 = vld [vmem:[%s3275_s5 + $0x20] ss:$8 sps:$4 sm:$0xff]  }
   0xa   :  { %309 = vxpose.xlu0.b32.cont [3/15] (short) (narrow) %v262_v4, 8  ;;  %919 = vmatpush1.bf16.msra.mxu1 %v1772_v19  ;;  %v1781_v27 = vld [vmem:[%s3275_s5 + $0x34] ss:$8 sps:$4 sm:$0xff]   ;;  %v1783_v28 = vld [vmem:[%s3274_s3 + $0x30] ss:$8 sps:$4 sm:$0xff]   ;;  %v268_v37 = vld [vmem:[%s3273_s1 + $0xc0] sm:$0xff] }
   0xb   :  { %277 = vxpose.xlu1.b32.cont [3/16] (narrow) %v246_v5, 8  ;;  %513 = vmatprep.subr.bf16.mxu0 %v1773_v20  ;;  %v1784_v29 = vld [vmem:[%s3275_s5 + $0x30] ss:$8 sps:$4 sm:$0xff]   ;;  %v1785_v30 = vld [vmem:[%s3274_s3 + $0x44] ss:$8 sps:$4 sm:$0xff]  }
   0xc   :  { %920 = vmatprep.subr.bf16.mxu1 %v1775_v21  ;;  %v267_v31 = vld [vmem:[%s3273_s1 + $0xb8] sm:$0xff]  ;;  %v1787_v33 = vld [vmem:[%s3275_s5 + $0x44] ss:$8 sps:$4 sm:$0xff]   ;;  %v1789_v34 = vld [vmem:[%s3274_s3 + $0x40] ss:$8 sps:$4 sm:$0xff]  }
   0xd   :  { %514 = vmatpush1.bf16.msra.mxu0 %v1777_v24  ;;  %v251_v32 = vld [vmem:[%s3273_s1 + $0x38] sm:$0xff]  ;;  %v1790_v35 = vld [vmem:[%s3275_s5 + $0x40] ss:$8 sps:$4 sm:$0xff]   ;;  %v1797_v42 = vld [vmem:[%s3274_s3 + $0x64] ss:$8 sps:$4 sm:$0xff]  }
   0xe   :  { %310 = vxpose.xlu0.b32.cont [4/15] (short) (narrow) %v263_v6, 8  ;;  %921 = vmatpush1.bf16.msra.mxu1 %v1778_v25  ;;  %v1791_v36 = vld [vmem:[%s3274_s3 + $0x54] ss:$8 sps:$4 sm:$0xff]   ;;  %v252_v38 = vld [vmem:[%s3273_s1 + $0x40] sm:$0xff]  ;;  %v1795_v40 = vld [vmem:[%s3274_s3 + $0x50] ss:$8 sps:$4 sm:$0xff]  }
   0xf   :  { %278 = vxpose.xlu1.b32.cont [4/16] (narrow) %v247_v7, 8  ;;  %515 = vmatprep.subr.bf16.mxu0 %v1779_v26  ;;  %v1793_v39 = vld [vmem:[%s3275_s5 + $0x54] ss:$8 sps:$4 sm:$0xff]   ;;  %v1796_v41 = vld [vmem:[%s3275_s5 + $0x50] ss:$8 sps:$4 sm:$0xff]   ;;  %v269_v43 = vld [vmem:[%s3273_s1 + $0xc8] sm:$0xff] }
  0x10   :  { %922 = vmatprep.subr.bf16.mxu1 %v1781_v27  ;;  %v253_v44 = vld [vmem:[%s3273_s1 + $0x48] sm:$0xff]  ;;  %v1803_v48 = vld [vmem:[%s3274_s3 + $0x74] ss:$8 sps:$4 sm:$0xff]   ;;  %v1807_v52 = vld [vmem:[%s3274_s3 + $0x70] ss:$8 sps:$4 sm:$0xff]  }
  0x11   :  { %516 = vmatpush1.bf16.msra.mxu0 %v1783_v28  ;;  %v1799_v45 = vld [vmem:[%s3275_s5 + $0x64] ss:$8 sps:$4 sm:$0xff]   ;;  %v1801_v46 = vld [vmem:[%s3274_s3 + $0x60] ss:$8 sps:$4 sm:$0xff]   ;;  %v270_v49 = vld [vmem:[%s3273_s1 + $0xd0] sm:$0xff] }
  0x12   :  { %311 = vxpose.xlu0.b32.cont [5/15] (short) (narrow) %v264_v10, 8  ;;  %923 = vmatpush1.bf16.msra.mxu1 %v1784_v29  ;;  %v1802_v47 = vld [vmem:[%s3275_s5 + $0x60] ss:$8 sps:$4 sm:$0xff]   ;;  %v254_v50 = vld [vmem:[%s3273_s1 + $0x50] sm:$0xff]  ;;  %v271_v53 = vld [vmem:[%s3273_s1 + $0xd8] sm:$0xff] }
  0x13   :  { %279 = vxpose.xlu1.b32.cont [5/16] (narrow) %v248_v11, 8  ;;  %517 = vmatprep.subr.bf16.mxu0 %v1785_v30  ;;  %v1805_v51 = vld [vmem:[%s3275_s5 + $0x74] ss:$8 sps:$4 sm:$0xff]   ;;  %v1808_v54 = vld [vmem:[%s3275_s5 + $0x70] ss:$8 sps:$4 sm:$0xff]   ;;  %v272_v61 = vld [vmem:[%s3273_s1 + $0xe0] sm:$0xff] }
  0x14   :  { %924 = vmatprep.subr.bf16.mxu1 %v1787_v33  ;;  %v1809_v55 = vld [vmem:[%s3274_s3 + $0x84] ss:$8 sps:$4 sm:$0xff]   ;;  %v255_v56 = vld [vmem:[%s3273_s1 + $0x58] sm:$0xff]  ;;  %v1813_v58 = vld [vmem:[%s3274_s3 + $0x80] ss:$8 sps:$4 sm:$0xff]  }
  0x15   :  { %518 = vmatpush1.bf16.msra.mxu0 %v1789_v34  ;;  %v1811_v57 = vld [vmem:[%s3275_s5 + $0x84] ss:$8 sps:$4 sm:$0xff]   ;;  %v1814_v59 = vld [vmem:[%s3275_s5 + $0x80] ss:$8 sps:$4 sm:$0xff]   ;;  %v1815_v60 = vld [vmem:[%s3274_s3 + $0x94] ss:$8 sps:$4 sm:$0xff]  }
  0x16   :  { %312 = vxpose.xlu0.b32.cont [6/15] (short) (narrow) %v265_v15, 8  ;;  %925 = vmatpush1.bf16.msra.mxu1 %v1790_v35  ;;  %v256_v62 = vld [vmem:[%s3273_s1 + $0x60] sm:$0xff]  ;;  %v1817_v63 = vld [vmem:[%s3275_s5 + $0x94] ss:$8 sps:$4 sm:$0xff]   ;;  %v1819_v0 = vld [vmem:[%s3274_s3 + $0x90] ss:$8 sps:$4 sm:$0xff]  }
  0x17   :  { %280 = vxpose.xlu1.b32.cont [6/16] (narrow) %v249_v18, 8  ;;  %519 = vmatprep.subr.bf16.mxu0 %v1791_v36  ;;  %v1820_v1 = vld [vmem:[%s3275_s5 + $0x90] ss:$8 sps:$4 sm:$0xff]   ;;  %v1821_v2 = vld [vmem:[%s3274_s3 + $0xa4] ss:$8 sps:$4 sm:$0xff]  }
  0x18   :  { %926 = vmatprep.subr.bf16.mxu1 %v1793_v39  ;;  %v273_v3 = vld [vmem:[%s3273_s1 + $0xe8] sm:$0xff]  ;;  %v2251_v8 = vld [vmem:[%s3274_s3 + $0xb4] ss:$8 sps:$4 sm:$0xff]   ;;  %v274_v9 = vld [vmem:[%s3273_s1 + $0xf0] sm:$0x1] }
  0x19   :  { %520 = vmatpush1.bf16.msra.mxu0 %v1795_v40  ;;  %v257_v4 = vld [vmem:[%s3273_s1 + $0x68] sm:$0xff]  ;;  %v258_v10 = vld [vmem:[%s3273_s1 + $0x70] sm:$0xff]  ;;  %v259_v15 = vld [vmem:[%s3273_s1 + $0x78] sm:$0xff] }
  0x1a   :  { %313 = vxpose.xlu0.b32.cont [7/15] (short) (narrow) %v266_v22, 8  ;;  %927 = vmatpush1.bf16.msra.mxu1 %v1796_v41  ;;  %v2236_v5 = vld [vmem:[%s3275_s5 + $0xa4] ss:$8 sps:$4 sm:$0xff]   ;;  %v2241_v6 = vld [vmem:[%s3274_s3 + $0xa0] ss:$8 sps:$4 sm:$0xff]   ;;  %v165_v33 = vld [vmem:[%s3276_s0 + $0x90] sm:$0xff] }
  0x1b   :  { %281 = vxpose.xlu1.b32.cont [7/16] (narrow) %v250_v23, 8  ;;  %521 = vmatprep.subr.bf16.mxu0 %v1797_v42  ;;  %v2246_v7 = vld [vmem:[%s3275_s5 + $0xa0] ss:$8 sps:$4 sm:$0xff]   ;;  %v2263_v11 = vld [vmem:[%s3275_s5 + $0xb4] ss:$8 sps:$4 sm:$0xff]  }
  0x1c   :  { %928 = vmatprep.subr.bf16.mxu1 %v1799_v45  ;;  %v2269_v12 = vld [vmem:[%s3274_s3 + $0xb0] ss:$8 sps:$4 sm:$0xff]   ;;  %v2281_v14 = vld [vmem:[%s3274_s3 + $0xc4] ss:$8 sps:$4 sm:$0xff]   ;;  %v2299_v18 = vld [vmem:[%s3274_s3 + $0xc0] ss:$8 sps:$4 sm:$0xff]  }
  0x1d   :  { %522 = vmatpush1.bf16.msra.mxu0 %v1801_v46  ;;  %v2276_v13 = vld [vmem:[%s3275_s5 + $0xb0] ss:$8 sps:$4 sm:$0xff]   ;;  %v163_v16 = vld [vmem:[%s3276_s0 + $0x80] sm:$0xff]  ;;  %v164_v20 = vld [vmem:[%s3276_s0 + $0x88] sm:$0xff] }
  0x1e   :  { %314 = vxpose.xlu0.b32.cont [8/15] (short) (narrow) %v267_v31, 8  ;;  %929 = vmatpush1.bf16.msra.mxu1 %v1802_v47  ;;  %v2293_v17 = vld [vmem:[%s3275_s5 + $0xc4] ss:$8 sps:$4 sm:$0xff]   ;;  %v2312_v21 = vld [vmem:[%s3275_s5 + $0xc0] ss:$8 sps:$4 sm:$0xff]   ;;  %v1990_v31 = vmov 0  }
  0x1f   :  { %282 = vxpose.xlu1.b32.cont [8/16] (narrow) %v251_v32, 8  ;;  %523 = vmatprep.subr.bf16.mxu0 %v1803_v48  ;;  %v147_v19 = vld [vmem:[%s3276_s0] sm:$0xff]  ;;  %v2317_v22 = vld [vmem:[%s3274_s3 + $0xd4] ss:$8 sps:$4 sm:$0xff]   ;;  %v2331_v25 = vld [vmem:[%s3274_s3 + $0xd0] ss:$8 sps:$4 sm:$0xff]  }
  0x20   :  { %930 = vmatprep.subr.bf16.mxu1 %v1805_v51  ;;  %v2322_v23 = vld [vmem:[%s3275_s5 + $0xd4] ss:$8 sps:$4 sm:$0xff]   ;;  %v2342_v27 = vld [vmem:[%s3275_s5 + $0xd0] ss:$8 sps:$4 sm:$0xff]   ;;  %v2347_v28 = vld [vmem:[%s3274_s3 + $0xe4] ss:$8 sps:$4 sm:$0xff]  }
  0x21   :  { %524 = vmatpush1.bf16.msra.mxu0 %v1807_v52  ;;  %v84_v24 = vld [vmem:[%s3274_s3 + $0xf0] sm:$0x11]  ;;  %v148_v30 = vld [vmem:[%s3276_s0 + $0x8] sm:$0xff]  ;;  %v2352_v32 = vsel %vm500_vm0, 65535, %v1990_v31  ;;  %v166_v42 = vld [vmem:[%s3276_s0 + $0x98] sm:$0xff] }
  0x22   :  { %315 = vxpose.xlu0.b32.cont [9/15] (short) (narrow) %v268_v37, 8  ;;  %931 = vmatpush1.bf16.msra.mxu1 %v1808_v54  ;;  %v146_v26 = vld [vmem:[%s3275_s5 + $0xf0] sm:$0x11]  ;;  %v1582_v29 = vcombine.high %v84_v24, %v84_v24  ;;  %v2361_v34 = vld [vmem:[%s3275_s5 + $0xe4] ss:$8 sps:$4 sm:$0xff]   ;;  %v1581_v37 = vcombine.low %v84_v24, %v84_v24  ;;  %v150_v47 = vld [vmem:[%s3276_s0 + $0x18] sm:$0xff] }
  0x23   :  { %283 = vxpose.xlu1.b32.cont [9/16] (narrow) %v252_v38, 8  ;;  %525 = vmatprep.subr.bf16.mxu0 %v1809_v55  ;;  %v1648_v35 = vcombine.high %v146_v26, %v146_v26  ;;  %v2367_v36 = vld [vmem:[%s3274_s3 + $0xe0] ss:$8 sps:$4 sm:$0xff]   ;;  %v1647_v40 = vcombine.low %v146_v26, %v146_v26  ;;  %v149_v41 = vld [vmem:[%s3276_s0 + $0x10] sm:$0xff]  ;;  %v2401_v46 = vld [vmem:[%s3277_s2 + $0x4] ss:$8 sps:$4 sm:$0xff]  }
  0x24   :  { %932 = vmatprep.subr.bf16.mxu1 %v1811_v57  ;;  %v2374_v38 = vld [vmem:[%s3275_s5 + $0xe0] ss:$8 sps:$4 sm:$0xff]   ;;  %v2377_v39 = vand.u32 %v1582_v29, %v2352_v32  ;;  %v153_v54 = vld [vmem:[%s3276_s0 + $0x30] sm:$0xff]  ;;  %v170_v55 = vld [vmem:[%s3276_s0 + $0xb8] sm:$0xff] }
  0x25   :  { %526 = vmatpush1.bf16.msra.mxu0 %v1813_v58  ;;  %v2396_v45 = vand.u32 %v1647_v40, %v2352_v32  ;;  %v167_v48 = vld [vmem:[%s3276_s0 + $0xa0] sm:$0xff]  ;;  %v168_v51 = vld [vmem:[%s3276_s0 + $0xa8] sm:$0xff]  ;;  %v177_v24 = vld [vmem:[%s3276_s0 + $0xf0] sm:$0x1] }
  0x26   :  { %316 = vxpose.xlu0.b32.cont [10/15] (short) (narrow) %v269_v43, 8  ;;  %933 = vmatpush1.bf16.msra.mxu1 %v1814_v59  ;;  %v2387_v43 = vand.u32 %v1648_v35, %v2352_v32  ;;  %v152_v52 = vld [vmem:[%s3276_s0 + $0x28] sm:$0xff]  ;;  %v171_v57 = vld [vmem:[%s3276_s0 + $0xc0] sm:$0xff]  ;;  %v1730_v35 = vld [vmem:[%s3273_s1 + $0x178] sm:$0xff] }
  0x27   :  { %284 = vxpose.xlu1.b32.cont [10/16] (narrow) %v253_v44, 8  ;;  %527 = vmatprep.subr.bf16.mxu0 %v1815_v60  ;;  %v2391_v44 = vand.u32 %v1581_v37, %v2352_v32  ;;  %v155_v58 = vld [vmem:[%s3276_s0 + $0x40] sm:$0xff]  ;;  %v172_v59 = vld [vmem:[%s3276_s0 + $0xc8] sm:$0xff]  ;;  %v162_v37 = vld [vmem:[%s3276_s0 + $0x78] sm:$0xff] }
  0x28   :  { %934 = vmatprep.subr.bf16.mxu1 %v1817_v63  ;;  %v156_v60 = vld [vmem:[%s3276_s0 + $0x48] sm:$0xff]  ;;  %v174_v63 = vld [vmem:[%s3276_s0 + $0xd8] sm:$0xff] }
  0x29   :  { %528 = vmatpush1.bf16.msra.mxu0 %v1819_v0  ;;  %v158_v0 = vld [vmem:[%s3276_s0 + $0x58] sm:$0xff] }
  0x2a   :  { %317 = vxpose.xlu0.b32.cont [11/15] (short) (narrow) %v270_v49, 8  ;;  %935 = vmatpush1.bf16.msra.mxu1 %v1820_v1  ;;  %v2413_v49 = vld [vmem:[%s3278_s4 + $0x4] ss:$8 sps:$4 sm:$0xff]   ;;  %v1714_v40 = vld [vmem:[%s3273_s1 + $0xf8] sm:$0xff] }
  0x2b   :  { %285 = vxpose.xlu1.b32.cont [11/16] (narrow) %v254_v50, 8  ;;  %529 = vmatprep.subr.bf16.mxu0 %v1821_v2  ;;  %v151_v50 = vld [vmem:[%s3276_s0 + $0x20] sm:$0xff] }
  0x2c   :  { %936 = vmatprep.subr.bf16.mxu1 %v2236_v5  ;;  %v175_v1 = vld [vmem:[%s3276_s0 + $0xe0] sm:$0xff] }
  0x2d   :  { %530 = vmatpush1.bf16.msra.mxu0 %v2241_v6  ;;  %v159_v2 = vld [vmem:[%s3276_s0 + $0x60] sm:$0xff] }
  0x2e   :  { %318 = vxpose.xlu0.b32.cont [12/15] (short) (narrow) %v271_v53, 8  ;;  %937 = vmatpush1.bf16.msra.mxu1 %v2246_v7  ;;  %v169_v53 = vld [vmem:[%s3276_s0 + $0xb0] sm:$0xff] }
  0x2f   :  { %286 = vxpose.xlu1.b32.cont [12/16] (narrow) %v255_v56, 8  ;;  %531 = vmatprep.subr.bf16.mxu0 %v2251_v8  ;;  %v154_v56 = vld [vmem:[%s3276_s0 + $0x38] sm:$0xff] }
  0x30   :  { %938 = vmatprep.subr.bf16.mxu1 %v2263_v11 }
  0x31   :  { %532 = vmatpush1.bf16.msra.mxu0 %v2269_v12 }
  0x32   :  { %319 = vxpose.xlu0.b32.cont [13/15] (short) (narrow) %v272_v61, 8  ;;  %939 = vmatpush1.bf16.msra.mxu1 %v2276_v13  ;;  %v173_v61 = vld [vmem:[%s3276_s0 + $0xd0] sm:$0xff] }
  0x33   :  { %287 = vxpose.xlu1.b32.cont [13/16] (narrow) %v256_v62, 8  ;;  %533 = vmatprep.subr.bf16.mxu0 %v2281_v14  ;;  %v157_v62 = vld [vmem:[%s3276_s0 + $0x50] sm:$0xff] }
  0x34   :  { %940 = vmatprep.subr.bf16.mxu1 %v2293_v17 }
  0x35   :  { %534 = vmatpush1.bf16.msra.mxu0 %v2299_v18 }
  0x36   :  { %320 = vxpose.xlu0.b32.cont [14/15] (short) (narrow) %v273_v3, 8  ;;  %941 = vmatpush1.bf16.msra.mxu1 %v2312_v21  ;;  %v176_v3 = vld [vmem:[%s3276_s0 + $0xe8] sm:$0xff] }
  0x37   :  { %288 = vxpose.xlu1.b32.cont [14/16] (narrow) %v257_v4, 8  ;;  %535 = vmatprep.subr.bf16.mxu0 %v2317_v22  ;;  %v53_v4 = vld [vmem:[%s3277_s2 + $0xf0] sm:$0x11] }
  0x38   :  { %942 = vmatprep.subr.bf16.mxu1 %v2322_v23 }
  0x39   :  { %536 = vmatpush1.bf16.msra.mxu0 %v2331_v25 }
  0x3a   :  { %321 = vxpose.xlu0.b32.end [15/15] (short) (narrow) %v274_v9, 8  ;;  %943 = vmatpush1.bf16.msra.mxu1 %v2342_v27  ;;  %v1614_v9 = vcombine.low %v53_v4, %v53_v4 }
  0x3b   :  { %289 = vxpose.xlu1.b32.cont [15/16] (narrow) %v258_v10, 8  ;;  %537 = vmatprep.subr.bf16.mxu0 %v2347_v28  ;;  %v1615_v10 = vcombine.high %v53_v4, %v53_v4  ;;  %v1735_v4 = vld [vmem:[%s3273_s1 + $0x1a0] sm:$0xff] }
  0x3c   :  { %944 = vmatprep.subr.bf16.mxu1 %v2361_v34  ;;  %v2489_v29 = vand.u32 %v1614_v9, %v2352_v32  ;;  %v2608_v9 = vld [vmem:[%s3277_s2 + $0x30] ss:$8 sps:$4 sm:$0xff]  }
  0x3d   :  { %538 = vmatpush1.bf16.msra.mxu0 %v2367_v36  ;;  %v2486_v26 = vand.u32 %v1615_v10, %v2352_v32  ;;  %v2613_v10 = vld [vmem:[%s3278_s4 + $0x30] ss:$8 sps:$4 sm:$0xff]  }
  0x3e   :  { %210 = vxpose.xlu0.b32.start [1/15] (short) (narrow) %v163_v16, 8  ;;  %945 = vmatpush1.bf16.msra.mxu1 %v2374_v38 }
  0x3f   :  { %290 = vxpose.xlu1.b32.end [16/16] (narrow) %v259_v15, 8  ;;  %539 = vmatprep.subr.bf16.mxu0 %v2377_v39  ;;  %v115_v15 = vld [vmem:[%s3278_s4 + $0xf0] sm:$0x11] }
  0x40   :  { %946 = vmatprep.subr.bf16.mxu1 %v2387_v43  ;;  %v1680_v16 = vcombine.low %v115_v15, %v115_v15 }
  0x41   :  { %540 = vmatpush1.bf16.msra.mxu0 %v2391_v44 }
  0x42   :  { %211 = vxpose.xlu0.b32.cont [2/15] (short) (narrow) %v164_v20, 8  ;;  %947 = vmatpush1.bf16.msra.mxu1 %v2396_v45  ;;  %v160_v20 = vld [vmem:[%s3276_s0 + $0x68] sm:$0xff]  ;;  %v2495_v31 = vand.u32 %v1680_v16, %v2352_v32  ;;  %v1718_v16 = vld [vmem:[%s3273_s1 + $0x118] sm:$0xff] }
  0x43   :  { %178 = vxpose.xlu1.b32.start [1/16] (narrow) %v147_v19, 8  ;;  %714 = vmatprep.subr.bf16.mxu0 %v2401_v46  ;;  %v1681_v19 = vcombine.high %v115_v15, %v115_v15  ;;  %v2619_v15 = vld [vmem:[%s3277_s2 + $0x44] ss:$8 sps:$4 sm:$0xff]  }
  0x44   :  { %1118 = vmatprep.subr.bf16.mxu1 %v2413_v49 }
  0x46   :  { %212 = vxpose.xlu0.b32.cont [3/15] (short) (narrow) %v165_v33, 8  ;;  %v161_v33 = vld [vmem:[%s3276_s0 + $0x70] sm:$0xff] }
  0x47   :  { %179 = vxpose.xlu1.b32.cont [2/16] (narrow) %v148_v30, 8  ;;  %v2492_v30 = vand.u32 %v1681_v19, %v2352_v32  ;;  %v1731_v32 = vld [vmem:[%s3273_s1 + $0x180] sm:$0xff] }
  0x48   :  { %v2628_v19 = vld [vmem:[%s3278_s4 + $0x44] ss:$8 sps:$4 sm:$0xff]  }
  0x49   :  { %3310 = vst [vmem:[#allocation2_spill] sm:$0xff] %v2492_v30 }
  0x4a   :  { %213 = vxpose.xlu0.b32.cont [4/15] (short) (narrow) %v166_v42, 8 }
  0x4b   :  { %180 = vxpose.xlu1.b32.cont [3/16] (narrow) %v149_v41, 8  ;;  %v1732_v41 = vld [vmem:[%s3273_s1 + $0x188] sm:$0xff] }
  0x4e   :  { %214 = vxpose.xlu0.b32.cont [5/15] (short) (narrow) %v167_v48, 8 }
  0x4f   :  { %181 = vxpose.xlu1.b32.cont [4/16] (narrow) %v150_v47, 8 }
  0x52   :  { %215 = vxpose.xlu0.b32.cont [6/15] (short) (narrow) %v168_v51, 8  ;;  %v2518_v51 = vld [vmem:[%s3277_s2] ss:$8 sps:$4 sm:$0xff]  }
  0x53   :  { %182 = vxpose.xlu1.b32.cont [5/16] (narrow) %v151_v50, 8 }
  0x56   :  { %216 = vxpose.xlu0.b32.cont [7/15] (short) (narrow) %v169_v53, 8  ;;  %v2528_v53 = vld [vmem:[%s3277_s2 + $0x14] ss:$8 sps:$4 sm:$0xff]  }
  0x57   :  { %183 = vxpose.xlu1.b32.cont [6/16] (narrow) %v152_v52, 8  ;;  %v2523_v52 = vld [vmem:[%s3278_s4] ss:$8 sps:$4 sm:$0xff]  }
  0x5a   :  { %217 = vxpose.xlu0.b32.cont [8/15] (short) (narrow) %v170_v55, 8  ;;  %v2538_v55 = vld [vmem:[%s3278_s4 + $0x14] ss:$8 sps:$4 sm:$0xff]  }
  0x5b   :  { %184 = vxpose.xlu1.b32.cont [7/16] (narrow) %v153_v54, 8  ;;  %v1715_v54 = vld [vmem:[%s3273_s1 + $0x100] sm:$0xff] }
  0x5e   :  { %218 = vxpose.xlu0.b32.cont [9/15] (short) (narrow) %v171_v57, 8  ;;  %v2548_v57 = vld [vmem:[%s3277_s2 + $0x10] ss:$8 sps:$4 sm:$0xff]  }
  0x5f   :  { %185 = vxpose.xlu1.b32.cont [8/16] (narrow) %v154_v56, 8  ;;  %v1733_v56 = vld [vmem:[%s3273_s1 + $0x190] sm:$0xff] }
  0x62   :  { %219 = vxpose.xlu0.b32.cont [10/15] (short) (narrow) %v172_v59, 8  ;;  %v2559_v59 = vld [vmem:[%s3277_s2 + $0x24] ss:$8 sps:$4 sm:$0xff]  }
  0x63   :  { %186 = vxpose.xlu1.b32.cont [9/16] (narrow) %v155_v58, 8  ;;  %v2553_v58 = vld [vmem:[%s3278_s4 + $0x10] ss:$8 sps:$4 sm:$0xff]  }
  0x66   :  { %220 = vxpose.xlu0.b32.cont [11/15] (short) (narrow) %v173_v61, 8  ;;  %v2568_v61 = vld [vmem:[%s3278_s4 + $0x24] ss:$8 sps:$4 sm:$0xff]  }
  0x67   :  { %187 = vxpose.xlu1.b32.cont [10/16] (narrow) %v156_v60, 8  ;;  %v1716_v60 = vld [vmem:[%s3273_s1 + $0x108] sm:$0xff] }
  0x6a   :  { %221 = vxpose.xlu0.b32.cont [12/15] (short) (narrow) %v174_v63, 8  ;;  %v2578_v63 = vld [vmem:[%s3277_s2 + $0x20] ss:$8 sps:$4 sm:$0xff]  }
  0x6b   :  { %188 = vxpose.xlu1.b32.cont [11/16] (narrow) %v157_v62, 8  ;;  %v1734_v62 = vld [vmem:[%s3273_s1 + $0x198] sm:$0xff] }
  0x6e   :  { %222 = vxpose.xlu0.b32.cont [13/15] (short) (narrow) %v175_v1, 8  ;;  %v2589_v1 = vld [vmem:[%s3277_s2 + $0x34] ss:$8 sps:$4 sm:$0xff]  }
  0x6f   :  { %189 = vxpose.xlu1.b32.cont [12/16] (narrow) %v158_v0, 8  ;;  %v2583_v0 = vld [vmem:[%s3278_s4 + $0x20] ss:$8 sps:$4 sm:$0xff]  }
  0x72   :  { %223 = vxpose.xlu0.b32.cont [14/15] (short) (narrow) %v176_v3, 8  ;;  %v2598_v3 = vld [vmem:[%s3278_s4 + $0x34] ss:$8 sps:$4 sm:$0xff]  }
  0x73   :  { %190 = vxpose.xlu1.b32.cont [13/16] (narrow) %v159_v2, 8  ;;  %v1717_v2 = vld [vmem:[%s3273_s1 + $0x110] sm:$0xff] }
  0x76   :  { %224 = vxpose.xlu0.b32.end [15/15] (short) (narrow) %v177_v24, 8  ;;  %v2638_v24 = vld [vmem:[%s3277_s2 + $0x40] ss:$8 sps:$4 sm:$0xff]  }
  0x77   :  { %191 = vxpose.xlu1.b32.cont [14/16] (narrow) %v160_v20, 8  ;;  %v1736_v20 = vld [vmem:[%s3273_s1 + $0x1a8] sm:$0xff] }
  0x7a   :  { %1332 = vxpose.xlu0.b32.start [1/15] (short) (narrow) %v1730_v35, 8  ;;  %v2649_v35 = vld [vmem:[%s3277_s2 + $0x54] ss:$8 sps:$4 sm:$0xff]  }
  0x7b   :  { %192 = vxpose.xlu1.b32.cont [15/16] (narrow) %v161_v33, 8  ;;  %v2643_v33 = vld [vmem:[%s3278_s4 + $0x40] ss:$8 sps:$4 sm:$0xff]  }
  0x7e   :  { %1333 = vxpose.xlu0.b32.cont [2/15] (short) (narrow) %v1731_v32, 8  ;;  %v2658_v32 = vld [vmem:[%s3278_s4 + $0x54] ss:$8 sps:$4 sm:$0xff]  }
  0x7f   :  { %193 = vxpose.xlu1.b32.end [16/16] (narrow) %v162_v37, 8  ;;  %v1719_v37 = vld [vmem:[%s3273_s1 + $0x120] sm:$0xff] }
  0x82   :  { %v323_v42 = vpop.trf.xlu0  ;;  %1334 = vxpose.xlu0.b32.cont [3/15] (short) (narrow) %v1732_v41, 8  ;;  %v2668_v41 = vld [vmem:[%s3277_s2 + $0x50] ss:$8 sps:$4 sm:$0xff]  }
  0x83   :  { %1300 = vxpose.xlu1.b32.start [1/16] (narrow) %v1714_v40, 8  ;;  %v291_v47 = vpop.trf.xlu1  ;;  %v340_v48 = vpack.c.bf16 %v323_v42, %v323_v42  ;;  %v1737_v40 = vld [vmem:[%s3273_s1 + $0x1b0] sm:$0xff] }
  0x84   :  { %v339_v50 = vpack.c.bf16 %v291_v47, %v291_v47  ;;  %v2673_v42 = vld [vmem:[%s3278_s4 + $0x50] ss:$8 sps:$4 sm:$0xff]   ;;  %v2679_v47 = vld [vmem:[%s3277_s2 + $0x64] ss:$8 sps:$4 sm:$0xff]  }
  0x85   :  { %1583 = vmatprep.mubr.msk.bf16.mxu0 %vm496_vm1, %v340_v48  ;;  %1649 = vmatprep.mubr.msk.bf16.mxu1 %vm496_vm1, %v340_v48  ;;  %v1720_v48 = vld [vmem:[%s3273_s1 + $0x128] sm:$0xff] }
  0x86   :  { %542 = vmatmul.mubr.bf16.vlgmr.msra.gmra.mrb[0].mxu0 %v339_v50  ;;  %949 = vmatmul.mubr.bf16.vlgmr.msra.gmra.mrb[0].mxu1 %v339_v50  ;;  %v2688_v50 = vld [vmem:[%s3278_s4 + $0x64] ss:$8 sps:$4 sm:$0xff]  }
  0x87   :  { %715 = vmatpush1.bf16.msra.mxu0 %v2518_v51  ;;  %1119 = vmatpush1.bf16.msra.mxu1 %v2523_v52 }
  0x88   :  { %1301 = vxpose.xlu1.b32.cont [2/16] (narrow) %v1715_v54, 8  ;;  %716 = vmatprep.subr.bf16.mxu0 %v2528_v53  ;;  %v1738_v54 = vld [vmem:[%s3273_s1 + $0x1b8] sm:$0xff] }
  0x89   :  { %1120 = vmatprep.subr.bf16.mxu1 %v2538_v55  ;;  %1335 = vxpose.xlu0.b32.cont [4/15] (short) (narrow) %v1733_v56, 8  ;;  %v2698_v56 = vld [vmem:[%s3277_s2 + $0x60] ss:$8 sps:$4 sm:$0xff]  }
  0x8b   :  { %717 = vmatpush1.bf16.msra.mxu0 %v2548_v57  ;;  %1121 = vmatpush1.bf16.msra.mxu1 %v2553_v58 }
  0x8c   :  { %1302 = vxpose.xlu1.b32.cont [3/16] (narrow) %v1716_v60, 8  ;;  %718 = vmatprep.subr.bf16.mxu0 %v2559_v59  ;;  %v2703_v60 = vld [vmem:[%s3278_s4 + $0x60] ss:$8 sps:$4 sm:$0xff]  }
  0x8d   :  { %1122 = vmatprep.subr.bf16.mxu1 %v2568_v61  ;;  %1336 = vxpose.xlu0.b32.cont [5/15] (short) (narrow) %v1734_v62, 8  ;;  %3311 = vst [vmem:[#allocation3_spill] sm:$0xff] %v2703_v60  ;;  %v2709_v62 = vld [vmem:[%s3277_s2 + $0x74] ss:$8 sps:$4 sm:$0xff]  }
  0x8e   :  { %3312 = vst [vmem:[#allocation4_spill] sm:$0xff] %v2709_v62 }
  0x8f   :  { %719 = vmatpush1.bf16.msra.mxu0 %v2578_v63  ;;  %1123 = vmatpush1.bf16.msra.mxu1 %v2583_v0 }
  0x90   :  { %1303 = vxpose.xlu1.b32.cont [4/16] (narrow) %v1717_v2, 8  ;;  %720 = vmatprep.subr.bf16.mxu0 %v2589_v1  ;;  %v1721_v2 = vld [vmem:[%s3273_s1 + $0x130] sm:$0xff] }
  0x91   :  { %1124 = vmatprep.subr.bf16.mxu1 %v2598_v3  ;;  %1337 = vxpose.xlu0.b32.cont [6/15] (short) (narrow) %v1735_v4, 8  ;;  %v2718_v4 = vld [vmem:[%s3278_s4 + $0x74] ss:$8 sps:$4 sm:$0xff]  }
  0x92   :  { %3313 = vst [vmem:[#allocation5_spill] sm:$0xff] %v2718_v4 }
  0x93   :  { %721 = vmatpush1.bf16.msra.mxu0 %v2608_v9  ;;  %1125 = vmatpush1.bf16.msra.mxu1 %v2613_v10 }
  0x94   :  { %1304 = vxpose.xlu1.b32.cont [5/16] (narrow) %v1718_v16, 8  ;;  %722 = vmatprep.subr.bf16.mxu0 %v2619_v15  ;;  %v1739_v16 = vld [vmem:[%s3273_s1 + $0x1c0] sm:$0xff] }
  0x95   :  { %1126 = vmatprep.subr.bf16.mxu1 %v2628_v19  ;;  %1338 = vxpose.xlu0.b32.cont [7/15] (short) (narrow) %v1736_v20, 8  ;;  %v2728_v20 = vld [vmem:[%s3277_s2 + $0x70] ss:$8 sps:$4 sm:$0xff]  }
  0x96   :  { %3314 = vst [vmem:[#allocation6_spill] sm:$0xff] %v2728_v20 }
  0x97   :  { %723 = vmatpush1.bf16.msra.mxu0 %v2638_v24  ;;  %1127 = vmatpush1.bf16.msra.mxu1 %v2643_v33 }
  0x98   :  { %1305 = vxpose.xlu1.b32.cont [6/16] (narrow) %v1719_v37, 8  ;;  %724 = vmatprep.subr.bf16.mxu0 %v2649_v35  ;;  %v2733_v37 = vld [vmem:[%s3278_s4 + $0x70] ss:$8 sps:$4 sm:$0xff]  }
  0x99   :  { %1128 = vmatprep.subr.bf16.mxu1 %v2658_v32  ;;  %1339 = vxpose.xlu0.b32.cont [8/15] (short) (narrow) %v1737_v40, 8  ;;  %3315 = vst [vmem:[#allocation7_spill] sm:$0xff] %v2733_v37  ;;  %v2739_v40 = vld [vmem:[%s3277_s2 + $0x84] ss:$8 sps:$4 sm:$0xff]  }
  0x9a   :  { %3316 = vst [vmem:[#allocation8_spill] sm:$0xff] %v2739_v40 }
  0x9b   :  { %725 = vmatpush1.bf16.msra.mxu0 %v2668_v41  ;;  %1129 = vmatpush1.bf16.msra.mxu1 %v2673_v42 }
  0x9c   :  { %1306 = vxpose.xlu1.b32.cont [7/16] (narrow) %v1720_v48, 8  ;;  %726 = vmatprep.subr.bf16.mxu0 %v2679_v47  ;;  %v1722_v48 = vld [vmem:[%s3273_s1 + $0x138] sm:$0xff] }
  0x9d   :  { %1130 = vmatprep.subr.bf16.mxu1 %v2688_v50  ;;  %1340 = vxpose.xlu0.b32.cont [9/15] (short) (narrow) %v1738_v54, 8  ;;  %v2748_v54 = vld [vmem:[%s3278_s4 + $0x84] ss:$8 sps:$4 sm:$0xff]  }
  0x9e   :  { %3317 = vst [vmem:[#allocation9_spill] sm:$0xff] %v2748_v54 }
  0x9f   :  { %727 = vmatpush1.bf16.msra.mxu0 %v2698_v56  ;;  %1131 = vmatpush1.bf16.msra.mxu1 %v2703_v60  ;;  %v1701_v60 = vld [vmem:[%s3276_s0 + $0x188] sm:$0xff] }
  0xa0   :  { %1307 = vxpose.xlu1.b32.cont [8/16] (narrow) %v1721_v2, 8  ;;  %728 = vmatprep.subr.bf16.mxu0 %v2709_v62  ;;  %v1740_v2 = vld [vmem:[%s3273_s1 + $0x1c8] sm:$0xff] }
  0xa1   :  { %1132 = vmatprep.subr.bf16.mxu1 %v2718_v4  ;;  %1341 = vxpose.xlu0.b32.cont [10/15] (short) (narrow) %v1739_v16, 8  ;;  %v2758_v4 = vld [vmem:[%s3277_s2 + $0x80] ss:$8 sps:$4 sm:$0xff]   ;;  %v2769_v16 = vld [vmem:[%s3277_s2 + $0x94] ss:$8 sps:$4 sm:$0xff]  }
  0xa2   :  { %3318 = vst [vmem:[#allocation10_spill] sm:$0xff] %v2758_v4  ;;  %v2763_v62 = vld [vmem:[%s3278_s4 + $0x80] ss:$8 sps:$4 sm:$0xff]   ;;  %3320 = vst [vmem:[#allocation12_spill] sm:$0xff] %v2769_v16 }
  0xa3   :  { %729 = vmatpush1.bf16.msra.mxu0 %v2728_v20  ;;  %1133 = vmatpush1.bf16.msra.mxu1 %v2733_v37  ;;  %3319 = vst [vmem:[#allocation11_spill] sm:$0xff] %v2763_v62  ;;  %v1723_v37 = vld [vmem:[%s3273_s1 + $0x140] sm:$0xff]  ;;  %v2778_v20 = vld [vmem:[%s3278_s4 + $0x94] ss:$8 sps:$4 sm:$0xff]  }
  0xa4   :  { %1308 = vxpose.xlu1.b32.cont [9/16] (narrow) %v1722_v48, 8  ;;  %730 = vmatprep.subr.bf16.mxu0 %v2739_v40  ;;  %3321 = vst [vmem:[#allocation13_spill] sm:$0xff] %v2778_v20  ;;  %v1741_v48 = vld [vmem:[%s3273_s1 + $0x1d0] sm:$0xff] }
  0xa5   :  { %1134 = vmatprep.subr.bf16.mxu1 %v2748_v54  ;;  %1342 = vxpose.xlu0.b32.cont [11/15] (short) (narrow) %v1740_v2, 8  ;;  %v2788_v54 = vld [vmem:[%s3277_s2 + $0x90] ss:$8 sps:$4 sm:$0xff]   ;;  %v2799_v2 = vld [vmem:[%s3277_s2 + $0xa4] ss:$8 sps:$4 sm:$0xff]  }
  0xa6   :  { %3322 = vst [vmem:[#allocation14_spill] sm:$0xff] %v2788_v54  ;;  %v2793_v40 = vld [vmem:[%s3278_s4 + $0x90] ss:$8 sps:$4 sm:$0xff]   ;;  %3324 = vst [vmem:[#allocation16_spill] sm:$0xff] %v2799_v2 }
  0xa7   :  { %731 = vmatpush1.bf16.msra.mxu0 %v2758_v4  ;;  %1135 = vmatpush1.bf16.msra.mxu1 %v2763_v62  ;;  %3323 = vst [vmem:[#allocation15_spill] sm:$0xff] %v2793_v40  ;;  %v1724_v62 = vld [vmem:[%s3273_s1 + $0x148] sm:$0xff] }
  0xa8   :  { %1309 = vxpose.xlu1.b32.cont [10/16] (narrow) %v1723_v37, 8  ;;  %732 = vmatprep.subr.bf16.mxu0 %v2769_v16  ;;  %v2808_v4 = vld [vmem:[%s3278_s4 + $0xa4] ss:$8 sps:$4 sm:$0xff]   ;;  %v1742_v37 = vld [vmem:[%s3273_s1 + $0x1d8] sm:$0xff]  ;;  %v2823_v16 = vld [vmem:[%s3278_s4 + $0xa0] ss:$8 sps:$4 sm:$0xff]  }
  0xa9   :  { %1136 = vmatprep.subr.bf16.mxu1 %v2778_v20  ;;  %3325 = vst [vmem:[#allocation17_spill] sm:$0xff] %v2808_v4  ;;  %1343 = vxpose.xlu0.b32.cont [12/15] (short) (narrow) %v1741_v48, 8  ;;  %v2818_v20 = vld [vmem:[%s3277_s2 + $0xa0] ss:$8 sps:$4 sm:$0xff]   ;;  %3327 = vst [vmem:[#allocation19_spill] sm:$0xff] %v2823_v16 }
  0xaa   :  { %3326 = vst [vmem:[#allocation18_spill] sm:$0xff] %v2818_v20  ;;  %v2829_v48 = vld [vmem:[%s3277_s2 + $0xb4] ss:$8 sps:$4 sm:$0xff]  }
  0xab   :  { %733 = vmatpush1.bf16.msra.mxu0 %v2788_v54  ;;  %1137 = vmatpush1.bf16.msra.mxu1 %v2793_v40  ;;  %3328 = vst [vmem:[#allocation20_spill] sm:$0xff] %v2829_v48  ;;  %v1725_v40 = vld [vmem:[%s3273_s1 + $0x150] sm:$0xff] }
  0xac   :  { %1310 = vxpose.xlu1.b32.cont [11/16] (narrow) %v1724_v62, 8  ;;  %734 = vmatprep.subr.bf16.mxu0 %v2799_v2  ;;  %v2838_v54 = vld [vmem:[%s3278_s4 + $0xb4] ss:$8 sps:$4 sm:$0xff]   ;;  %v1743_v62 = vld [vmem:[%s3273_s1 + $0x1e0] sm:$0xff]  ;;  %v2853_v2 = vld [vmem:[%s3278_s4 + $0xb0] ss:$8 sps:$4 sm:$0xff]  }
  0xad   :  { %1138 = vmatprep.subr.bf16.mxu1 %v2808_v4  ;;  %3329 = vst [vmem:[#allocation21_spill] sm:$0xff] %v2838_v54  ;;  %1344 = vxpose.xlu0.b32.cont [13/15] (short) (narrow) %v1742_v37, 8  ;;  %v2848_v4 = vld [vmem:[%s3277_s2 + $0xb0] ss:$8 sps:$4 sm:$0xff]   ;;  %3331 = vst [vmem:[#allocation23_spill] sm:$0xff] %v2853_v2 }
  0xae   :  { %3330 = vst [vmem:[#allocation22_spill] sm:$0xff] %v2848_v4  ;;  %v2859_v37 = vld [vmem:[%s3277_s2 + $0xc4] ss:$8 sps:$4 sm:$0xff]  }
  0xaf   :  { %735 = vmatpush1.bf16.msra.mxu0 %v2818_v20  ;;  %1139 = vmatpush1.bf16.msra.mxu1 %v2823_v16  ;;  %3332 = vst [vmem:[#allocation24_spill] sm:$0xff] %v2859_v37  ;;  %v1726_v16 = vld [vmem:[%s3273_s1 + $0x158] sm:$0xff]  ;;  %v2868_v20 = vld [vmem:[%s3278_s4 + $0xc4] ss:$8 sps:$4 sm:$0xff]  }
  0xb0   :  { %1311 = vxpose.xlu1.b32.cont [12/16] (narrow) %v1725_v40, 8  ;;  %736 = vmatprep.subr.bf16.mxu0 %v2829_v48  ;;  %3333 = vst [vmem:[#allocation25_spill] sm:$0xff] %v2868_v20  ;;  %v1744_v40 = vld [vmem:[%s3273_s1 + $0x1e8] sm:$0x1] }
  0xb1   :  { %1140 = vmatprep.subr.bf16.mxu1 %v2838_v54  ;;  %1345 = vxpose.xlu0.b32.cont [14/15] (short) (narrow) %v1743_v62, 8  ;;  %v2878_v54 = vld [vmem:[%s3277_s2 + $0xc0] ss:$8 sps:$4 sm:$0xff]   ;;  %v2889_v62 = vld [vmem:[%s3277_s2 + $0xd4] ss:$8 sps:$4 sm:$0xff]  }
  0xb2   :  { %3334 = vst [vmem:[#allocation26_spill] sm:$0xff] %v2878_v54  ;;  %v2883_v48 = vld [vmem:[%s3278_s4 + $0xc0] ss:$8 sps:$4 sm:$0xff]   ;;  %3336 = vst [vmem:[#allocation28_spill] sm:$0xff] %v2889_v62 }
  0xb3   :  { %737 = vmatpush1.bf16.msra.mxu0 %v2848_v4  ;;  %1141 = vmatpush1.bf16.msra.mxu1 %v2853_v2  ;;  %3335 = vst [vmem:[#allocation27_spill] sm:$0xff] %v2883_v48  ;;  %v1727_v2 = vld [vmem:[%s3273_s1 + $0x160] sm:$0xff]  ;;  %v2898_v4 = vld [vmem:[%s3278_s4 + $0xd4] ss:$8 sps:$4 sm:$0xff]  }
  0xb4   :  { %1312 = vxpose.xlu1.b32.cont [13/16] (narrow) %v1726_v16, 8  ;;  %738 = vmatprep.subr.bf16.mxu0 %v2859_v37  ;;  %3337 = vst [vmem:[#allocation29_spill] sm:$0xff] %v2898_v4  ;;  %v1699_v16 = vld [vmem:[%s3276_s0 + $0x178] sm:$0xff] }
  0xb5   :  { %1142 = vmatprep.subr.bf16.mxu1 %v2868_v20  ;;  %1346 = vxpose.xlu0.b32.end [15/15] (short) (narrow) %v1744_v40, 8  ;;  %v2908_v20 = vld [vmem:[%s3277_s2 + $0xd0] ss:$8 sps:$4 sm:$0xff]   ;;  %v2919_v40 = vld [vmem:[%s3277_s2 + $0xe4] ss:$8 sps:$4 sm:$0xff]  }
  0xb6   :  { %3338 = vst [vmem:[#allocation30_spill] sm:$0xff] %v2908_v20  ;;  %v2913_v37 = vld [vmem:[%s3278_s4 + $0xd0] ss:$8 sps:$4 sm:$0xff]  }
  0xb7   :  { %739 = vmatpush1.bf16.msra.mxu0 %v2878_v54  ;;  %1143 = vmatpush1.bf16.msra.mxu1 %v2883_v48  ;;  %3339 = vst [vmem:[#allocation31_spill] sm:$0xff] %v2913_v37  ;;  %v1728_v48 = vld [vmem:[%s3273_s1 + $0x168] sm:$0xff] }
  0xb8   :  { %1313 = vxpose.xlu1.b32.cont [14/16] (narrow) %v1727_v2, 8  ;;  %740 = vmatprep.subr.bf16.mxu0 %v2889_v62  ;;  %v2928_v54 = vld [vmem:[%s3278_s4 + $0xe4] ss:$8 sps:$4 sm:$0xff]   ;;  %v2943_v62 = vld [vmem:[%s3278_s4 + $0xe0] ss:$8 sps:$4 sm:$0xff]  }
  0xb9   :  { %1144 = vmatprep.subr.bf16.mxu1 %v2898_v4  ;;  %1234 = vxpose.xlu0.b32.start [1/15] (short) (narrow) %v1699_v16, 8  ;;  %v1700_v2 = vld [vmem:[%s3276_s0 + $0x180] sm:$0xff]  ;;  %v1729_v16 = vld [vmem:[%s3273_s1 + $0x170] sm:$0xff] }
  0xba   :  { %v2938_v4 = vld [vmem:[%s3277_s2 + $0xe0] ss:$8 sps:$4 sm:$0xff]  }
  0xbb   :  { %741 = vmatpush1.bf16.msra.mxu0 %v2908_v20  ;;  %1145 = vmatpush1.bf16.msra.mxu1 %v2913_v37 }
  0xbc   :  { %1314 = vxpose.xlu1.b32.cont [15/16] (narrow) %v1728_v48, 8  ;;  %742 = vmatprep.subr.bf16.mxu0 %v2919_v40  ;;  %v1683_v48 = vld [vmem:[%s3276_s0 + $0xf8] sm:$0xff] }
  0xbd   :  { %1146 = vmatprep.subr.bf16.mxu1 %v2928_v54  ;;  %1235 = vxpose.xlu0.b32.cont [2/15] (short) (narrow) %v1700_v2, 8 }
  0xbe   :  { %v226_v37 = vpop.trf.xlu0 }
  0xbf   :  { %743 = vmatpush1.bf16.msra.mxu0 %v2938_v4  ;;  %1147 = vmatpush1.bf16.msra.mxu1 %v2943_v62  ;;  %v243_v20 = vpack.c.bf16 %v226_v37, %v226_v37 }
  0xc0   :  { %1315 = vxpose.xlu1.b32.end [16/16] (narrow) %v1729_v16, 8  ;;  %744 = vmatprep.subr.bf16.mxu0 %v2486_v26  ;;  %v1949_v16 = vld [vmem:[%s3274_s3 + $0x4] ss:$8 sps:$4 sm:$0xff]  }
  0xc1   :  { %1148 = vmatprep.subr.bf16.mxu1 %v2492_v30  ;;  %1616 = vmatprep.mubr.msk.bf16.mxu0 %vm496_vm1, %v243_v20  ;;  %v1950_v30 = vld [vmem:[%s3275_s5 + $0x4] ss:$8 sps:$4 sm:$0xff]  }
  0xc2   :  { %1682 = vmatprep.mubr.msk.bf16.mxu1 %vm496_vm1, %v243_v20  ;;  %1236 = vxpose.xlu0.b32.cont [3/15] (short) (narrow) %v1701_v60, 8  ;;  %v1684_v60 = vld [vmem:[%s3276_s0 + $0x100] sm:$0xff]  ;;  %v1702_v20 = vld [vmem:[%s3276_s0 + $0x190] sm:$0xff] }
  0xc3   :  { %v194_v2 = vpop.trf.xlu1  ;;  %745 = vmatpush1.bf16.msra.mxu0 %v2489_v29  ;;  %1149 = vmatpush1.bf16.msra.mxu1 %v2495_v31 }
  0xc4   :  { %v242_v37 = vpack.c.bf16 %v194_v2, %v194_v2  ;;  %1202 = vxpose.xlu1.b32.start [1/16] (narrow) %v1683_v48, 8  ;;  %1369 = vmatprep.subr.bf16.mxu0 %v1949_v16  ;;  %v1951_v48 = vld [vmem:[%s3274_s3] ss:$8 sps:$4 sm:$0xff]  }
  0xc5   :  { %1454 = vmatprep.subr.bf16.mxu1 %v1950_v30  ;;  %v1952_v2 = vld [vmem:[%s3275_s5] ss:$8 sps:$4 sm:$0xff]   ;;  %v1953_v30 = vld [vmem:[%s3274_s3 + $0x14] ss:$8 sps:$4 sm:$0xff]  }
  0xc6   :  { %747 = vmatmul.mubr.bf16.vlgmr.msra.gmra.mrb[0].mxu0 %v242_v37  ;;  %1151 = vmatmul.mubr.bf16.vlgmr.msra.gmra.mrb[4].mxu1 %v242_v37  ;;  %v1954_v37 = vld [vmem:[%s3275_s5 + $0x14] ss:$8 sps:$4 sm:$0xff]   ;;  %v1685_v16 = vld [vmem:[%s3276_s0 + $0x108] sm:$0xff] }
  0xc7   :  { %1370 = vmatpush1.bf16.msra.mxu0 %v1951_v48  ;;  %1455 = vmatpush1.bf16.msra.mxu1 %v1952_v2  ;;  %v1703_v48 = vld [vmem:[%s3276_s0 + $0x198] sm:$0xff] }
  0xc8   :  { %1203 = vxpose.xlu1.b32.cont [2/16] (narrow) %v1684_v60, 8  ;;  %1371 = vmatprep.subr.bf16.mxu0 %v1953_v30  ;;  %v1955_v60 = vld [vmem:[%s3274_s3 + $0x10] ss:$8 sps:$4 sm:$0xff]   ;;  %v1957_v30 = vld [vmem:[%s3274_s3 + $0x24] ss:$8 sps:$4 sm:$0xff]  }
  0xc9   :  { %1456 = vmatprep.subr.bf16.mxu1 %v1954_v37  ;;  %1237 = vxpose.xlu0.b32.cont [4/15] (short) (narrow) %v1702_v20, 8  ;;  %v1956_v2 = vld [vmem:[%s3275_s5 + $0x10] ss:$8 sps:$4 sm:$0xff]   ;;  %v1958_v20 = vld [vmem:[%s3275_s5 + $0x24] ss:$8 sps:$4 sm:$0xff]  }
  0xca   :  { %v1686_v37 = vld [vmem:[%s3276_s0 + $0x110] sm:$0xff] }
  0xcb   :  { %1372 = vmatpush1.bf16.msra.mxu0 %v1955_v60  ;;  %1457 = vmatpush1.bf16.msra.mxu1 %v1956_v2  ;;  %v1704_v60 = vld [vmem:[%s3276_s0 + $0x1a0] sm:$0xff] }
  0xcc   :  { %1204 = vxpose.xlu1.b32.cont [3/16] (narrow) %v1685_v16, 8  ;;  %1373 = vmatprep.subr.bf16.mxu0 %v1957_v30  ;;  %v1959_v16 = vld [vmem:[%s3274_s3 + $0x20] ss:$8 sps:$4 sm:$0xff]   ;;  %v1961_v30 = vld [vmem:[%s3274_s3 + $0x34] ss:$8 sps:$4 sm:$0xff]  }
  0xcd   :  { %1458 = vmatprep.subr.bf16.mxu1 %v1958_v20  ;;  %1238 = vxpose.xlu0.b32.cont [5/15] (short) (narrow) %v1703_v48, 8  ;;  %v1960_v2 = vld [vmem:[%s3275_s5 + $0x20] ss:$8 sps:$4 sm:$0xff]   ;;  %v1962_v48 = vld [vmem:[%s3275_s5 + $0x34] ss:$8 sps:$4 sm:$0xff]  }
  0xce   :  { %v1687_v20 = vld [vmem:[%s3276_s0 + $0x118] sm:$0xff] }
  0xcf   :  { %1374 = vmatpush1.bf16.msra.mxu0 %v1959_v16  ;;  %1459 = vmatpush1.bf16.msra.mxu1 %v1960_v2  ;;  %v1705_v16 = vld [vmem:[%s3276_s0 + $0x1a8] sm:$0xff]  ;;  %v1964_v2 = vld [vmem:[%s3275_s5 + $0x30] ss:$8 sps:$4 sm:$0xff]  }
  0xd0   :  { %1205 = vxpose.xlu1.b32.cont [4/16] (narrow) %v1686_v37, 8  ;;  %1375 = vmatprep.subr.bf16.mxu0 %v1961_v30  ;;  %v1963_v37 = vld [vmem:[%s3274_s3 + $0x30] ss:$8 sps:$4 sm:$0xff]   ;;  %v1965_v30 = vld [vmem:[%s3274_s3 + $0x44] ss:$8 sps:$4 sm:$0xff]  }
  0xd1   :  { %1460 = vmatprep.subr.bf16.mxu1 %v1962_v48  ;;  %1239 = vxpose.xlu0.b32.cont [6/15] (short) (narrow) %v1704_v60, 8  ;;  %v1966_v60 = vld [vmem:[%s3275_s5 + $0x44] ss:$8 sps:$4 sm:$0xff]  }
  0xd2   :  { %v1688_v48 = vld [vmem:[%s3276_s0 + $0x120] sm:$0xff] }
  0xd3   :  { %1376 = vmatpush1.bf16.msra.mxu0 %v1963_v37  ;;  %1461 = vmatpush1.bf16.msra.mxu1 %v1964_v2  ;;  %v1706_v37 = vld [vmem:[%s3276_s0 + $0x1b0] sm:$0xff]  ;;  %v1968_v2 = vld [vmem:[%s3275_s5 + $0x40] ss:$8 sps:$4 sm:$0xff]  }
  0xd4   :  { %1206 = vxpose.xlu1.b32.cont [5/16] (narrow) %v1687_v20, 8  ;;  %1377 = vmatprep.subr.bf16.mxu0 %v1965_v30  ;;  %v1967_v20 = vld [vmem:[%s3274_s3 + $0x40] ss:$8 sps:$4 sm:$0xff]   ;;  %v1969_v30 = vld [vmem:[%s3274_s3 + $0x54] ss:$8 sps:$4 sm:$0xff]  }
  0xd5   :  { %1462 = vmatprep.subr.bf16.mxu1 %v1966_v60  ;;  %1240 = vxpose.xlu0.b32.cont [7/15] (short) (narrow) %v1705_v16, 8  ;;  %v1970_v16 = vld [vmem:[%s3275_s5 + $0x54] ss:$8 sps:$4 sm:$0xff]   ;;  %v1689_v60 = vld [vmem:[%s3276_s0 + $0x128] sm:$0xff] }
  0xd7   :  { %1378 = vmatpush1.bf16.msra.mxu0 %v1967_v20  ;;  %1463 = vmatpush1.bf16.msra.mxu1 %v1968_v2  ;;  %v1707_v20 = vld [vmem:[%s3276_s0 + $0x1b8] sm:$0xff] }
  0xd8   :  { %1207 = vxpose.xlu1.b32.cont [6/16] (narrow) %v1688_v48, 8  ;;  %1379 = vmatprep.subr.bf16.mxu0 %v1969_v30  ;;  %v1971_v48 = vld [vmem:[%s3274_s3 + $0x50] ss:$8 sps:$4 sm:$0xff]   ;;  %v1973_v30 = vld [vmem:[%s3274_s3 + $0x64] ss:$8 sps:$4 sm:$0xff]  }
  0xd9   :  { %1464 = vmatprep.subr.bf16.mxu1 %v1970_v16  ;;  %1241 = vxpose.xlu0.b32.cont [8/15] (short) (narrow) %v1706_v37, 8  ;;  %v1972_v2 = vld [vmem:[%s3275_s5 + $0x50] ss:$8 sps:$4 sm:$0xff]   ;;  %v1974_v37 = vld [vmem:[%s3275_s5 + $0x64] ss:$8 sps:$4 sm:$0xff]  }
  0xda   :  { %v1690_v16 = vld [vmem:[%s3276_s0 + $0x130] sm:$0xff] }
  0xdb   :  { %1380 = vmatpush1.bf16.msra.mxu0 %v1971_v48  ;;  %1465 = vmatpush1.bf16.msra.mxu1 %v1972_v2  ;;  %v1708_v48 = vld [vmem:[%s3276_s0 + $0x1c0] sm:$0xff] }
  0xdc   :  { %1208 = vxpose.xlu1.b32.cont [7/16] (narrow) %v1689_v60, 8  ;;  %1381 = vmatprep.subr.bf16.mxu0 %v1973_v30  ;;  %v1975_v60 = vld [vmem:[%s3274_s3 + $0x60] ss:$8 sps:$4 sm:$0xff]   ;;  %v1977_v30 = vld [vmem:[%s3274_s3 + $0x74] ss:$8 sps:$4 sm:$0xff]  }
  0xdd   :  { %1466 = vmatprep.subr.bf16.mxu1 %v1974_v37  ;;  %1242 = vxpose.xlu0.b32.cont [9/15] (short) (narrow) %v1707_v20, 8  ;;  %v1976_v2 = vld [vmem:[%s3275_s5 + $0x60] ss:$8 sps:$4 sm:$0xff]   ;;  %v1978_v20 = vld [vmem:[%s3275_s5 + $0x74] ss:$8 sps:$4 sm:$0xff]  }
  0xde   :  { %v1691_v37 = vld [vmem:[%s3276_s0 + $0x138] sm:$0xff] }
  0xdf   :  { %1382 = vmatpush1.bf16.msra.mxu0 %v1975_v60  ;;  %1467 = vmatpush1.bf16.msra.mxu1 %v1976_v2  ;;  %v1709_v60 = vld [vmem:[%s3276_s0 + $0x1c8] sm:$0xff]  ;;  %v1980_v2 = vld [vmem:[%s3275_s5 + $0x70] ss:$8 sps:$4 sm:$0xff]  }
  0xe0   :  { %1209 = vxpose.xlu1.b32.cont [8/16] (narrow) %v1690_v16, 8  ;;  %1383 = vmatprep.subr.bf16.mxu0 %v1977_v30  ;;  %v1979_v16 = vld [vmem:[%s3274_s3 + $0x70] ss:$8 sps:$4 sm:$0xff]   ;;  %v1981_v30 = vld [vmem:[%s3274_s3 + $0x84] ss:$8 sps:$4 sm:$0xff]  }
  0xe1   :  { %1468 = vmatprep.subr.bf16.mxu1 %v1978_v20  ;;  %1243 = vxpose.xlu0.b32.cont [10/15] (short) (narrow) %v1708_v48, 8  ;;  %v1982_v48 = vld [vmem:[%s3275_s5 + $0x84] ss:$8 sps:$4 sm:$0xff]  }
  0xe2   :  { %v1692_v20 = vld [vmem:[%s3276_s0 + $0x140] sm:$0xff] }
  0xe3   :  { %1384 = vmatpush1.bf16.msra.mxu0 %v1979_v16  ;;  %1469 = vmatpush1.bf16.msra.mxu1 %v1980_v2  ;;  %v1710_v16 = vld [vmem:[%s3276_s0 + $0x1d0] sm:$0xff]  ;;  %v1984_v2 = vld [vmem:[%s3275_s5 + $0x80] ss:$8 sps:$4 sm:$0xff]  }
  0xe4   :  { %1210 = vxpose.xlu1.b32.cont [9/16] (narrow) %v1691_v37, 8  ;;  %1385 = vmatprep.subr.bf16.mxu0 %v1981_v30  ;;  %v1983_v37 = vld [vmem:[%s3274_s3 + $0x80] ss:$8 sps:$4 sm:$0xff]   ;;  %v1985_v30 = vld [vmem:[%s3274_s3 + $0x94] ss:$8 sps:$4 sm:$0xff]  }
  0xe5   :  { %1470 = vmatprep.subr.bf16.mxu1 %v1982_v48  ;;  %1244 = vxpose.xlu0.b32.cont [11/15] (short) (narrow) %v1709_v60, 8  ;;  %v1986_v60 = vld [vmem:[%s3275_s5 + $0x94] ss:$8 sps:$4 sm:$0xff]   ;;  %v1693_v48 = vld [vmem:[%s3276_s0 + $0x148] sm:$0xff] }
  0xe7   :  { %1386 = vmatpush1.bf16.msra.mxu0 %v1983_v37  ;;  %1471 = vmatpush1.bf16.msra.mxu1 %v1984_v2  ;;  %v1711_v37 = vld [vmem:[%s3276_s0 + $0x1d8] sm:$0xff] }
  0xe8   :  { %1211 = vxpose.xlu1.b32.cont [10/16] (narrow) %v1692_v20, 8  ;;  %1387 = vmatprep.subr.bf16.mxu0 %v1985_v30  ;;  %v1987_v20 = vld [vmem:[%s3274_s3 + $0x90] ss:$8 sps:$4 sm:$0xff]   ;;  %v1989_v30 = vld [vmem:[%s3274_s3 + $0xa4] ss:$8 sps:$4 sm:$0xff]  }
  0xe9   :  { %1472 = vmatprep.subr.bf16.mxu1 %v1986_v60  ;;  %1245 = vxpose.xlu0.b32.cont [12/15] (short) (narrow) %v1710_v16, 8  ;;  %v1988_v2 = vld [vmem:[%s3275_s5 + $0x90] ss:$8 sps:$4 sm:$0xff]   ;;  %v1712_v60 = vld [vmem:[%s3276_s0 + $0x1e0] sm:$0xff] }
  0xea   :  { %v1694_v16 = vld [vmem:[%s3276_s0 + $0x150] sm:$0xff] }
  0xeb   :  { %1388 = vmatpush1.bf16.msra.mxu0 %v1987_v20  ;;  %1473 = vmatpush1.bf16.msra.mxu1 %v1988_v2 }
  0xec   :  { %1212 = vxpose.xlu1.b32.cont [11/16] (narrow) %v1693_v48, 8  ;;  %1389 = vmatprep.subr.bf16.mxu0 %v1989_v30  ;;  %v1713_v48 = vld [vmem:[%s3276_s0 + $0x1e8] sm:$0x1] }
  0xed   :  { %1474 = vmatprep.subr.bf16.mxu1 %v2236_v5  ;;  %1246 = vxpose.xlu0.b32.cont [13/15] (short) (narrow) %v1711_v37, 8  ;;  %v1695_v5 = vld [vmem:[%s3276_s0 + $0x158] sm:$0xff] }
  0xef   :  { %1390 = vmatpush1.bf16.msra.mxu0 %v2241_v6  ;;  %1475 = vmatpush1.bf16.msra.mxu1 %v2246_v7  ;;  %v1696_v6 = vld [vmem:[%s3276_s0 + $0x160] sm:$0xff]  ;;  %v1697_v7 = vld [vmem:[%s3276_s0 + $0x168] sm:$0xff] }
  0xf0   :  { %1213 = vxpose.xlu1.b32.cont [12/16] (narrow) %v1694_v16, 8  ;;  %1391 = vmatprep.subr.bf16.mxu0 %v2251_v8  ;;  %v1698_v8 = vld [vmem:[%s3276_s0 + $0x170] sm:$0xff] }
  0xf1   :  { %1476 = vmatprep.subr.bf16.mxu1 %v2263_v11  ;;  %1247 = vxpose.xlu0.b32.cont [14/15] (short) (narrow) %v1712_v60, 8 }
  0xf3   :  { %1392 = vmatpush1.bf16.msra.mxu0 %v2269_v12  ;;  %1477 = vmatpush1.bf16.msra.mxu1 %v2276_v13 }
  0xf4   :  { %1214 = vxpose.xlu1.b32.cont [13/16] (narrow) %v1695_v5, 8  ;;  %1393 = vmatprep.subr.bf16.mxu0 %v2281_v14 }
  0xf5   :  { %1478 = vmatprep.subr.bf16.mxu1 %v2293_v17  ;;  %1248 = vxpose.xlu0.b32.end [15/15] (short) (narrow) %v1713_v48, 8  ;;  %v3340_v17 = vld [vmem:[#allocation3_spill] sm:$0xff] }
  0xf7   :  { %1394 = vmatpush1.bf16.msra.mxu0 %v2299_v18  ;;  %1479 = vmatpush1.bf16.msra.mxu1 %v2312_v21  ;;  %v3341_v18 = vld [vmem:[#allocation4_spill] sm:$0xff]  ;;  %v3342_v21 = vld [vmem:[#allocation5_spill] sm:$0xff] }
  0xf8   :  { %1215 = vxpose.xlu1.b32.cont [14/16] (narrow) %v1696_v6, 8  ;;  %1395 = vmatprep.subr.bf16.mxu0 %v2317_v22  ;;  %v3343_v22 = vld [vmem:[#allocation6_spill] sm:$0xff] }
  0xf9   :  { %1480 = vmatprep.subr.bf16.mxu1 %v2322_v23  ;;  %v3344_v23 = vld [vmem:[#allocation7_spill] sm:$0xff] }
  0xfb   :  { %1396 = vmatpush1.bf16.msra.mxu0 %v2331_v25  ;;  %1481 = vmatpush1.bf16.msra.mxu1 %v2342_v27  ;;  %v3345_v25 = vld [vmem:[#allocation8_spill] sm:$0xff]  ;;  %v3346_v27 = vld [vmem:[#allocation9_spill] sm:$0xff] }
  0xfc   :  { %1216 = vxpose.xlu1.b32.cont [15/16] (narrow) %v1697_v7, 8  ;;  %1397 = vmatprep.subr.bf16.mxu0 %v2347_v28  ;;  %v3347_v28 = vld [vmem:[#allocation10_spill] sm:$0xff] }
  0xfd   :  { %1482 = vmatprep.subr.bf16.mxu1 %v2361_v34  ;;  %v1348_v11 = vpop.trf.xlu0  ;;  %v3348_v34 = vld [vmem:[#allocation11_spill] sm:$0xff] }
  0xfe   :  { %v1365_v12 = vpack.c.bf16 %v1348_v11, %v1348_v11 }
  0xff   :  { %1398 = vmatpush1.bf16.msra.mxu0 %v2367_v36  ;;  %1483 = vmatpush1.bf16.msra.mxu1 %v2374_v38  ;;  %v3349_v36 = vld [vmem:[#allocation12_spill] sm:$0xff]  ;;  %v3350_v38 = vld [vmem:[#allocation13_spill] sm:$0xff] }
 0x100   :  { %1217 = vxpose.xlu1.b32.end [16/16] (narrow) %v1698_v8, 8  ;;  %1399 = vmatprep.subr.bf16.mxu0 %v2377_v39  ;;  %v3351_v39 = vld [vmem:[#allocation14_spill] sm:$0xff] }
 0x101   :  { %1484 = vmatprep.subr.bf16.mxu1 %v2387_v43  ;;  %1747 = vmatprep.mubr.msk.bf16.mxu1 %vm496_vm1, %v1365_v12  ;;  %v3352_v43 = vld [vmem:[#allocation15_spill] sm:$0xff] }
 0x102   :  { %1745 = vmatprep.mubr.msk.bf16.mxu0 %vm496_vm1, %v1365_v12 }
 0x103   :  { %1400 = vmatpush1.bf16.msra.mxu0 %v2391_v44  ;;  %1485 = vmatpush1.bf16.msra.mxu1 %v2396_v45  ;;  %v3353_v44 = vld [vmem:[#allocation16_spill] sm:$0xff]  ;;  %v3354_v45 = vld [vmem:[#allocation17_spill] sm:$0xff] }
 0x104   :  { %v1316_v13 = vpop.trf.xlu1  ;;  %1413 = vmatprep.subr.bf16.mxu0 %v2401_v46  ;;  %1495 = vmatprep.subr.bf16.mxu1 %v2413_v49  ;;  %v3355_v46 = vld [vmem:[#allocation18_spill] sm:$0xff]  ;;  %v3356_v49 = vld [vmem:[#allocation19_spill] sm:$0xff] }
 0x105   :  { %v1364_v14 = vpack.c.bf16 %v1316_v13, %v1316_v13 }
 0x107   :  { %1487 = vmatmul.mubr.bf16.vlgmr.msra.gmra.mrb[8].mxu1 %v1364_v14  ;;  %1402 = vmatmul.mubr.bf16.vlgmr.msra.gmra.mrb[4].mxu0 %v1364_v14 }
 0x108   :  { %1414 = vmatpush1.bf16.msra.mxu0 %v2518_v51  ;;  %1496 = vmatpush1.bf16.msra.mxu1 %v2523_v52  ;;  %v3357_v51 = vld [vmem:[#allocation20_spill] sm:$0xff]  ;;  %v3358_v52 = vld [vmem:[#allocation21_spill] sm:$0xff] }
 0x109   :  { %1415 = vmatprep.subr.bf16.mxu0 %v2528_v53  ;;  %1497 = vmatprep.subr.bf16.mxu1 %v2538_v55  ;;  %v3359_v53 = vld [vmem:[#allocation22_spill] sm:$0xff]  ;;  %v3360_v55 = vld [vmem:[#allocation23_spill] sm:$0xff] }
 0x10c   :  { %1416 = vmatpush1.bf16.msra.mxu0 %v2548_v57  ;;  %1498 = vmatpush1.bf16.msra.mxu1 %v2553_v58  ;;  %v3361_v57 = vld [vmem:[#allocation24_spill] sm:$0xff]  ;;  %v3362_v58 = vld [vmem:[#allocation25_spill] sm:$0xff] }
 0x10d   :  { %1417 = vmatprep.subr.bf16.mxu0 %v2559_v59  ;;  %1499 = vmatprep.subr.bf16.mxu1 %v2568_v61  ;;  %v3363_v59 = vld [vmem:[#allocation26_spill] sm:$0xff]  ;;  %v3364_v61 = vld [vmem:[#allocation27_spill] sm:$0xff] }
 0x110   :  { %1418 = vmatpush1.bf16.msra.mxu0 %v2578_v63  ;;  %1500 = vmatpush1.bf16.msra.mxu1 %v2583_v0  ;;  %v3365_v63 = vld [vmem:[#allocation28_spill] sm:$0xff]  ;;  %v3366_v0 = vld [vmem:[#allocation29_spill] sm:$0xff] }
 0x111   :  { %1419 = vmatprep.subr.bf16.mxu0 %v2589_v1  ;;  %1501 = vmatprep.subr.bf16.mxu1 %v2598_v3  ;;  %v3367_v1 = vld [vmem:[#allocation30_spill] sm:$0xff]  ;;  %v3368_v3 = vld [vmem:[#allocation31_spill] sm:$0xff] }
 0x114   :  { %1420 = vmatpush1.bf16.msra.mxu0 %v2608_v9  ;;  %1502 = vmatpush1.bf16.msra.mxu1 %v2613_v10 }
 0x115   :  { %1421 = vmatprep.subr.bf16.mxu0 %v2619_v15  ;;  %1503 = vmatprep.subr.bf16.mxu1 %v2628_v19  ;;  %v3369_v15 = vld [vmem:[#allocation2_spill] sm:$0xff] }
 0x118   :  { %1422 = vmatpush1.bf16.msra.mxu0 %v2638_v24  ;;  %1504 = vmatpush1.bf16.msra.mxu1 %v2643_v33 }
 0x119   :  { %1423 = vmatprep.subr.bf16.mxu0 %v2649_v35  ;;  %1505 = vmatprep.subr.bf16.mxu1 %v2658_v32 }
 0x11c   :  { %1424 = vmatpush1.bf16.msra.mxu0 %v2668_v41  ;;  %1506 = vmatpush1.bf16.msra.mxu1 %v2673_v42 }
 0x11d   :  { %1425 = vmatprep.subr.bf16.mxu0 %v2679_v47  ;;  %1507 = vmatprep.subr.bf16.mxu1 %v2688_v50 }
 0x120   :  { %1426 = vmatpush1.bf16.msra.mxu0 %v2698_v56  ;;  %1508 = vmatpush1.bf16.msra.mxu1 %v3340_v17 }
 0x121   :  { %1427 = vmatprep.subr.bf16.mxu0 %v3341_v18  ;;  %1509 = vmatprep.subr.bf16.mxu1 %v3342_v21 }
 0x124   :  { %1428 = vmatpush1.bf16.msra.mxu0 %v3343_v22  ;;  %1510 = vmatpush1.bf16.msra.mxu1 %v3344_v23 }
 0x125   :  { %1429 = vmatprep.subr.bf16.mxu0 %v3345_v25  ;;  %1511 = vmatprep.subr.bf16.mxu1 %v3346_v27 }
 0x128   :  { %1430 = vmatpush1.bf16.msra.mxu0 %v3347_v28  ;;  %1512 = vmatpush1.bf16.msra.mxu1 %v3348_v34 }
 0x129   :  { %1431 = vmatprep.subr.bf16.mxu0 %v3349_v36  ;;  %1513 = vmatprep.subr.bf16.mxu1 %v3350_v38 }
 0x12c   :  { %1432 = vmatpush1.bf16.msra.mxu0 %v3351_v39  ;;  %1514 = vmatpush1.bf16.msra.mxu1 %v3352_v43 }
 0x12d   :  { %1433 = vmatprep.subr.bf16.mxu0 %v3353_v44  ;;  %1515 = vmatprep.subr.bf16.mxu1 %v3354_v45 }
 0x130   :  { %1434 = vmatpush1.bf16.msra.mxu0 %v3355_v46  ;;  %1516 = vmatpush1.bf16.msra.mxu1 %v3356_v49 }
 0x131   :  { %1435 = vmatprep.subr.bf16.mxu0 %v3357_v51  ;;  %1517 = vmatprep.subr.bf16.mxu1 %v3358_v52 }
 0x134   :  { %1436 = vmatpush1.bf16.msra.mxu0 %v3359_v53  ;;  %1518 = vmatpush1.bf16.msra.mxu1 %v3360_v55 }
 0x135   :  { %1437 = vmatprep.subr.bf16.mxu0 %v3361_v57  ;;  %1519 = vmatprep.subr.bf16.mxu1 %v3362_v58 }
 0x138   :  { %1438 = vmatpush1.bf16.msra.mxu0 %v3363_v59  ;;  %1520 = vmatpush1.bf16.msra.mxu1 %v3364_v61 }
 0x139   :  { %1439 = vmatprep.subr.bf16.mxu0 %v3365_v63  ;;  %1521 = vmatprep.subr.bf16.mxu1 %v3366_v0 }
 0x13c   :  { %1440 = vmatpush1.bf16.msra.mxu0 %v3367_v1  ;;  %1522 = vmatpush1.bf16.msra.mxu1 %v3368_v3 }
 0x13d   :  { %1441 = vmatprep.subr.bf16.mxu0 %v2919_v40  ;;  %1523 = vmatprep.subr.bf16.mxu1 %v2928_v54  ;;  %v1250_v9 = vpop.trf.xlu0 }
 0x13e   :  { %v1267_v10 = vpack.c.bf16 %v1250_v9, %v1250_v9 }
 0x140   :  { %1442 = vmatpush1.bf16.msra.mxu0 %v2938_v4  ;;  %1524 = vmatpush1.bf16.msra.mxu1 %v2943_v62 }
 0x141   :  { %1443 = vmatprep.subr.bf16.mxu0 %v2486_v26  ;;  %1525 = vmatprep.subr.bf16.mxu1 %v3369_v15 }
 0x142   :  { %1746 = vmatprep.mubr.msk.bf16.mxu0 %vm496_vm1, %v1267_v10  ;;  %1748 = vmatprep.mubr.msk.bf16.mxu1 %vm496_vm1, %v1267_v10 }
 0x144   :  { %1444 = vmatpush1.bf16.msra.mxu0 %v2489_v29  ;;  %1526 = vmatpush1.bf16.msra.mxu1 %v2495_v31  ;;  %v1218_v19 = vpop.trf.xlu1 }
 0x145   :  { %v1266_v24 = vpack.c.bf16 %v1218_v19, %v1218_v19 }
 0x147   :  { %1446 = vmatmul.mubr.bf16.vlgmr.msra.gmra.mrb[4].mxu0 %v1266_v24  ;;  %1528 = vmatmul.mubr.bf16.vlgmr.msra.gmra.mrb[12].mxu1 %v1266_v24 }
 0x159   :  { %v950_v33 = vpop.f32.mrb[0].mxu1 }
 0x15a   :  { %v952_v35 = vpop.f32.mrb[1].mxu1 }
 0x15b   :  { %v954_v32 = vpop.f32.mrb[2].mxu1 }
 0x15c   :  { %v955_v41 = vpop.f32.mrb[3].mxu1 }
 0x199   :  { %v748_v42 = vpop.f32.mrb[0].mxu0  ;;  %v1152_v26 = vpop.f32.mrb[4].mxu1 }
 0x19a   :  { %v1161_v47 = vrot.slane %v748_v42, 1  ;;  %v1153_v50 = vadd.f32 %v1152_v26, %v950_v33  ;;  %v750_v56 = vpop.f32.mrb[1].mxu0  ;;  %v1154_v4 = vpop.f32.mrb[5].mxu1 }
 0x19b   :  { %v1162_v54 = vrot.slane %v750_v56, 1  ;;  %v1155_v62 = vadd.f32 %v1154_v4, %v952_v35  ;;  %v752_v40 = vpop.f32.mrb[2].mxu0  ;;  %v1156_v29 = vpop.f32.mrb[6].mxu1 }
 0x19c   :  { %v1165_v37 = vadd.f32 %v1161_v47, %v1153_v50  ;;  %v753_v31 = vpop.f32.mrb[3].mxu0  ;;  %v1157_v20 = vpop.f32.mrb[7].mxu1 }
 0x19d   :  { %v1166_v2 = vadd.f32 %v1162_v54, %v1155_v62 }
 0x19e   :  { %1167 = vst [vmem:[%s3279_s6] sm:$0x7f] %v1165_v37 }
 0x19f   :  { %1169 = vst.msk [vmem:[%s3279_s6 + $0x8] sm:$0x7f] %vm1168_vm2, %v1166_v2 }
 0x1da   :  { %v1488_v30 = vpop.f32.mrb[8].mxu1 }
 0x1db   :  { %v1490_v16 = vpop.f32.mrb[9].mxu1 }
 0x1dc   :  { %v1492_v60 = vpop.f32.mrb[10].mxu1 }
 0x1dd   :  { %v1493_v5 = vpop.f32.mrb[11].mxu1 }
 0x21a   :  { %v1447_v48 = vpop.f32.mrb[4].mxu0  ;;  %v1529_v6 = vpop.f32.mrb[12].mxu1 }
 0x21b   :  { %v1538_v7 = vrot.slane %v1447_v48, 1  ;;  %v1530_v8 = vadd.f32 %v1529_v6, %v1488_v30  ;;  %v1449_v11 = vpop.f32.mrb[5].mxu0  ;;  %v1531_v12 = vpop.f32.mrb[13].mxu1 }
 0x21c   :  { %v1539_v13 = vrot.slane %v1449_v11, 1  ;;  %v1532_v14 = vadd.f32 %v1531_v12, %v1490_v16  ;;  %v1451_v17 = vpop.f32.mrb[6].mxu0  ;;  %v1533_v18 = vpop.f32.mrb[14].mxu1 }
 0x21d   :  { %v1542_v21 = vadd.f32 %v1538_v7, %v1530_v8  ;;  %v1452_v22 = vpop.f32.mrb[7].mxu0  ;;  %v1534_v23 = vpop.f32.mrb[15].mxu1 }
 0x21e   :  { %v1543_v25 = vadd.f32 %v1539_v13, %v1532_v14 }
 0x21f   :  { %1749 = vst [vmem:[%s3279_s6 + $0x10] sm:$0x7f] %v1542_v21 }
 0x220   :  { %1750 = vst.msk [vmem:[%s3279_s6 + $0x18] sm:$0x7f] %vm1168_vm2, %v1543_v25 }

</bundles_post_ra>
